<compile_context>
chip_gen: v5e
topology: v5e:2x2
jax: 0.10.0
libtpu: 0.0.40
codegen_flags: <defaults>
</compile_context>

<pallas_src>
import math

import jax
import jax.numpy as jnp
from jax.experimental import pallas as pl
from jax.experimental.pallas import tpu as pltpu

NFEATURES = 4
NUNITS = 64
TIME_EMB_SIZE = 32
NBLOCKS = 2
BETA = 1.0
THRESHOLD = 20.0
LN_EPS = 1e-5
MAX_TB = 512          # batch-tile (lane) cap; comfortable on v7x's 64 MiB VMEM


# --------------------------------------------------------------------------
# Kernel helpers (traced inside the Pallas body)
# --------------------------------------------------------------------------
def _silu(z):
    # sigmoid via EUP approximate reciprocal (exp also runs on the EUP slot).
    return z * pl.reciprocal(1.0 + jnp.exp(-z), approx=True)


def _layernorm_f(z, g, b):
    # Feature-major layout: normalized axis is axis 0 (sublanes).
    mu = jnp.mean(z, axis=0, keepdims=True)
    var = jnp.mean((z - mu) ** 2, axis=0, keepdims=True)
    return (z - mu) * jax.lax.rsqrt(var + LN_EPS) * g + b


# --------------------------------------------------------------------------
# Pallas kernel: time MLP + inblock + midblocks + outblock + softplus.
# All activations are (features, TB) slabs with the batch tile on lanes.
# --------------------------------------------------------------------------
def mlp_model_kernel(x_ref, ts_ref,
                     wt1_ref, bt1_ref, wt2_ref, bt2_ref,
                     win_ref, bin_ref, gin_ref, bein_ref,
                     wm_ref, bm_ref, wtp_ref, btp_ref, gm_ref, bem_ref,
                     wout_ref, bout_ref,
                     out_ref):
    f32 = jnp.float32

    # time_mlp ('learnable'): Linear(1, T) -> SiLU -> Linear(T, T) -> SiLU.
    # The K=1 first linear is a pure broadcast FMA on the VPU (no MXU pass).
    t = _silu(wt1_ref[...] * ts_ref[...] + bt1_ref[...])                  # (T, TB)
    t = _silu(jnp.dot(wt2_ref[...], t, preferred_element_type=f32)
              + bt2_ref[...])                                             # (T, TB)

    # inblock: Linear(F, U) -> LayerNorm(U) -> SiLU
    val = jnp.dot(win_ref[...], x_ref[...], preferred_element_type=f32) + bin_ref[...]
    val = _silu(_layernorm_f(val, gin_ref[...], bein_ref[...]))           # (U, TB)

    # Loop-invariant time projection for ALL blocks at once: (NBLOCKS*U, TB).
    tp = jnp.dot(wtp_ref[...], t, preferred_element_type=f32) + btp_ref[...]

    # midblocks: DiffusionBlockConditioned x NBLOCKS
    # TODO(synk): Block.DiffusionBlockConditioned source was not provided;
    # implemented as Linear(U,U) + time-embedding projection add + LayerNorm +
    # SiLU with residual skip connection (Dropout is identity at inference).
    for i in range(NBLOCKS):
        h = jnp.dot(wm_ref[i], val, preferred_element_type=f32) + bm_ref[i]
        h = h + tp[i * NUNITS:(i + 1) * NUNITS, :]
        h = _silu(_layernorm_f(h, gm_ref[i], bem_ref[i]))
        val = val + h

    # outblocks: zero_module(Linear(U, 2F))
    out = jnp.dot(wout_ref[...], val, preferred_element_type=f32) + bout_ref[...]

    # ZigZag post-processing: softplus(beta, threshold).
    bx = BETA * out
    sp = jnp.log1p(jnp.exp(jnp.minimum(bx, THRESHOLD))) / BETA
    out_ref[...] = jnp.where(bx > THRESHOLD, out, sp)                     # (2F, TB)


# --------------------------------------------------------------------------
# Wrapper
# --------------------------------------------------------------------------
def _round_up(n, m):
    return ((n + m - 1) // m) * m


@jax.jit
def mlp_model_forward(x, timestep, params):
    """x: (B, 1, NFEATURES), timestep: (B,)  ->  (B, 2, NFEATURES) (ZigZag)."""
    (wt1, bt1, wt2, bt2, win, binn, gin, bein,
     wm, bm, wtp, btp, gm, bem, wout, bout) = params

    B = x.shape[0]
    # Lane-dense batch tile; pad B in the wrapper (cheaper than in-kernel masks).
    TB = min(MAX_TB, _round_up(B, 128))
    Bp = _round_up(B, TB)

    xT = jnp.zeros((NFEATURES, Bp), jnp.float32).at[:, :B].set(
        x.reshape(B, NFEATURES).astype(jnp.float32).T)
    tsT = jnp.zeros((1, Bp), jnp.float32).at[:, :B].set(
        timestep.reshape(1, B).astype(jnp.float32))

    # Layout-only glue: pre-transpose weights to feature-major and stack the
    # per-block time projections so the kernel computes them once.
    wt1T, bt1T = wt1.T, bt1.T                              # (T,1), (T,1)
    wt2T, bt2T = wt2.T, bt2.T                              # (T,T), (T,1)
    winT, binT = win.T, binn.T                             # (U,F), (U,1)
    ginT, beinT = gin.T, bein.T                            # (U,1)
    wmT = jnp.transpose(wm, (0, 2, 1))                     # (NB,U,U)
    bmT = jnp.transpose(bm, (0, 2, 1))                     # (NB,U,1)
    wtpT = jnp.transpose(wtp, (0, 2, 1)).reshape(NBLOCKS * NUNITS, TIME_EMB_SIZE)
    btpT = jnp.transpose(btp, (0, 2, 1)).reshape(NBLOCKS * NUNITS, 1)
    gmT = jnp.transpose(gm, (0, 2, 1))                     # (NB,U,1)
    bemT = jnp.transpose(bem, (0, 2, 1))                   # (NB,U,1)
    woutT, boutT = wout.T, bout.T                          # (2F,U), (2F,1)

    weights = (wt1T, bt1T, wt2T, bt2T, winT, binT, ginT, beinT,
               wmT, bmT, wtpT, btpT, gmT, bemT, woutT, boutT)

    def batch_spec(rows):
        return pl.BlockSpec((rows, TB), lambda i: (0, i))

    def const_spec(a):
        return pl.BlockSpec(a.shape, lambda i, _nd=a.ndim: (0,) * _nd)

    outT = pl.pallas_call(
        mlp_model_kernel,
        out_shape=jax.ShapeDtypeStruct((2 * NFEATURES, Bp), jnp.float32),
        grid=(Bp // TB,),
        in_specs=[batch_spec(NFEATURES), batch_spec(1)]
                 + [const_spec(w) for w in weights],
        out_specs=batch_spec(2 * NFEATURES),
        compiler_params=pltpu.CompilerParams(
            dimension_semantics=("parallel",)),
    )(xT, tsT, *weights)

    # torch.split(val, F, dim=-1) + torch.concatenate(dim=1) on (B,1,2F) is a
    # pure reshape of the (B, 2F) slab.
    out2d = outT[:, :B].T
    return out2d.reshape(B, 2, NFEATURES)


# --------------------------------------------------------------------------
# Deterministic parameter construction (shapes from MLPModel.__init__)
# --------------------------------------------------------------------------
def _init_linear(key, fan_in, fan_out):
    kw, kb = jax.random.split(key)
    bound = 1.0 / math.sqrt(fan_in)
    w = jax.random.uniform(kw, (fan_in, fan_out), jnp.float32, -bound, bound)
    b = jax.random.uniform(kb, (1, fan_out), jnp.float32, -bound, bound)
    return w, b


def init_params(key):
    keys = jax.random.split(key, 4 + 2 * NBLOCKS)
    wt1, bt1 = _init_linear(keys[0], 1, TIME_EMB_SIZE)              # time_emb
    wt2, bt2 = _init_linear(keys[1], TIME_EMB_SIZE, TIME_EMB_SIZE)  # time_mlp[2]
    win, binn = _init_linear(keys[2], NFEATURES, NUNITS)            # linear_in
    gin = jnp.ones((1, NUNITS), jnp.float32)                        # LayerNorm
    bein = jnp.zeros((1, NUNITS), jnp.float32)

    wm, bm, wtp, btp = [], [], [], []
    for i in range(NBLOCKS):
        w, b = _init_linear(keys[3 + 2 * i], NUNITS, NUNITS)
        wm.append(w); bm.append(b)
        w, b = _init_linear(keys[4 + 2 * i], TIME_EMB_SIZE, NUNITS)
        wtp.append(w); btp.append(b)
    wm = jnp.stack(wm); bm = jnp.stack(bm)
    wtp = jnp.stack(wtp); btp = jnp.stack(btp)
    gm = jnp.ones((NBLOCKS, 1, NUNITS), jnp.float32)
    bem = jnp.zeros((NBLOCKS, 1, NUNITS), jnp.float32)

    # outblocks = zero_module(nn.Linear(nunits, 2*nfeatures)) -> zeros
    wout = jnp.zeros((NUNITS, 2 * NFEATURES), jnp.float32)
    bout = jnp.zeros((1, 2 * NFEATURES), jnp.float32)

    return (wt1, bt1, wt2, bt2, win, binn, gin, bein,
            wm, bm, wtp, btp, gm, bem, wout, bout)


# --------------------------------------------------------------------------
# Pure-JAX reference (same math in the original batch-major layout)
# --------------------------------------------------------------------------
def reference_forward(x, timestep, params):
    (wt1, bt1, wt2, bt2, win, binn, gin, bein,
     wm, bm, wtp, btp, gm, bem, wout, bout) = params
    B = x.shape[0]
    xv = x.reshape(B, NFEATURES).astype(jnp.float32)
    ts = timestep.reshape(B, 1).astype(jnp.float32)

    def silu(z):
        return z * jax.nn.sigmoid(z)

    def ln(z, g, b):
        mu = jnp.mean(z, axis=-1, keepdims=True)
        var = jnp.mean((z - mu) ** 2, axis=-1, keepdims=True)
        return (z - mu) / jnp.sqrt(var + LN_EPS) * g + b

    t = silu(ts @ wt1 + bt1)
    t = silu(t @ wt2 + bt2)
    val = silu(ln(xv @ win + binn, gin, bein))
    for i in range(NBLOCKS):
        h = val @ wm[i] + bm[i]
        h = h + t @ wtp[i] + btp[i]
        h = silu(ln(h, gm[i], bem[i]))
        val = val + h
    out = val @ wout + bout
    bx = BETA * out
    out = jnp.where(bx > THRESHOLD, out,
                    jnp.log1p(jnp.exp(jnp.minimum(bx, THRESHOLD))) / BETA)
    return out.reshape(B, 2, NFEATURES)


if __name__ == "__main__":
    key = jax.random.PRNGKey(0)
    kx, kt, kp, kd = jax.random.split(key, 4)
    B = 8
    x = jax.random.normal(kx, (B, 1, NFEATURES), dtype=jnp.float32)
    timestep = jax.random.uniform(kt, (B,), jnp.float32, 0.0, 1.0)
    params = init_params(kp)

    # Tolerance accounts for the EUP approximate reciprocal in SiLU (~2^-12
    # relative per activation, compounded over the blocks).
    ATOL = RTOL = 1e-2

    out = jax.block_until_ready(mlp_model_forward(x, timestep, params))
    assert out.shape == (B, 2, NFEATURES)
    ref = reference_forward(x, timestep, params)
    assert jnp.allclose(out, ref, atol=ATOL, rtol=RTOL), "mismatch (zeroed outblock)"

    # Datapath check with non-zero output weights (the real outblock is
    # zero-initialized, which would mask errors in the rest of the pipeline).
    wout_dbg, bout_dbg = _init_linear(kd, NUNITS, 2 * NFEATURES)
    params_dbg = params[:-2] + (wout_dbg, bout_dbg)
    out_dbg = jax.block_until_ready(mlp_model_forward(x, timestep, params_dbg))
    ref_dbg = reference_forward(x, timestep, params_dbg)
    assert jnp.allclose(out_dbg, ref_dbg, atol=ATOL, rtol=RTOL), "mismatch (debug outblock)"

    # Exercise the batch grid (more than one tile) and tail padding.
    B2 = 600
    kx2, kt2 = jax.random.split(kd)
    x2 = jax.random.normal(kx2, (B2, 1, NFEATURES), dtype=jnp.float32)
    t2 = jax.random.uniform(kt2, (B2,), jnp.float32, 0.0, 1.0)
    out2 = jax.block_until_ready(mlp_model_forward(x2, t2, params_dbg))
    ref2 = reference_forward(x2, t2, params_dbg)
    assert out2.shape == (B2, 2, NFEATURES)
    assert jnp.allclose(out2, ref2, atol=ATOL, rtol=RTOL), "mismatch (gridded batch)"

    print("KERNEL_OK")
</pallas_src>

<mosaic_0001>
module attributes {stable_mosaic.version = 11 : i64} {
  func.func @mlp_model_kernel(%arg0: i32, %arg1: memref<4x128xf32, #tpu.memory_space<vmem>>, %arg2: memref<1x128xf32, #tpu.memory_space<vmem>>, %arg3: memref<32x1xf32, #tpu.memory_space<vmem>>, %arg4: memref<32x1xf32, #tpu.memory_space<vmem>>, %arg5: memref<32x32xf32, #tpu.memory_space<vmem>>, %arg6: memref<32x1xf32, #tpu.memory_space<vmem>>, %arg7: memref<64x4xf32, #tpu.memory_space<vmem>>, %arg8: memref<64x1xf32, #tpu.memory_space<vmem>>, %arg9: memref<64x1xf32, #tpu.memory_space<vmem>>, %arg10: memref<64x1xf32, #tpu.memory_space<vmem>>, %arg11: memref<2x64x64xf32, #tpu.memory_space<vmem>>, %arg12: memref<2x64x1xf32, #tpu.memory_space<vmem>>, %arg13: memref<128x32xf32, #tpu.memory_space<vmem>>, %arg14: memref<128x1xf32, #tpu.memory_space<vmem>>, %arg15: memref<2x64x1xf32, #tpu.memory_space<vmem>>, %arg16: memref<2x64x1xf32, #tpu.memory_space<vmem>>, %arg17: memref<8x64xf32, #tpu.memory_space<vmem>>, %arg18: memref<8x1xf32, #tpu.memory_space<vmem>>, %arg19: memref<8x128xf32, #tpu.memory_space<vmem>>) attributes {dimension_semantics = [#tpu.dimension_semantics<parallel>], iteration_bounds = array<i64: 1>, scalar_prefetch = 0 : i64, scratch_operands = 0 : i64, tpu.core_type = #tpu.core_type<tc>, window_params = [{transform_indices = @transform_0, window_bounds = array<i64: 4, 128>}, {transform_indices = @transform_1, window_bounds = array<i64: 1, 128>}, {pipeline_mode = #tpu.pipeline_mode<synchronous>, transform_indices = @transform_2, window_bounds = array<i64: 32, 1>}, {pipeline_mode = #tpu.pipeline_mode<synchronous>, transform_indices = @transform_3, window_bounds = array<i64: 32, 1>}, {pipeline_mode = #tpu.pipeline_mode<synchronous>, transform_indices = @transform_4, window_bounds = array<i64: 32, 32>}, {pipeline_mode = #tpu.pipeline_mode<synchronous>, transform_indices = @transform_5, window_bounds = array<i64: 32, 1>}, {pipeline_mode = #tpu.pipeline_mode<synchronous>, transform_indices = @transform_6, window_bounds = array<i64: 64, 4>}, {pipeline_mode = #tpu.pipeline_mode<synchronous>, transform_indices = @transform_7, window_bounds = array<i64: 64, 1>}, {pipeline_mode = #tpu.pipeline_mode<synchronous>, transform_indices = @transform_8, window_bounds = array<i64: 64, 1>}, {pipeline_mode = #tpu.pipeline_mode<synchronous>, transform_indices = @transform_9, window_bounds = array<i64: 64, 1>}, {pipeline_mode = #tpu.pipeline_mode<synchronous>, transform_indices = @transform_10, window_bounds = array<i64: 2, 64, 64>}, {pipeline_mode = #tpu.pipeline_mode<synchronous>, transform_indices = @transform_11, window_bounds = array<i64: 2, 64, 1>}, {pipeline_mode = #tpu.pipeline_mode<synchronous>, transform_indices = @transform_12, window_bounds = array<i64: 128, 32>}, {pipeline_mode = #tpu.pipeline_mode<synchronous>, transform_indices = @transform_13, window_bounds = array<i64: 128, 1>}, {pipeline_mode = #tpu.pipeline_mode<synchronous>, transform_indices = @transform_14, window_bounds = array<i64: 2, 64, 1>}, {pipeline_mode = #tpu.pipeline_mode<synchronous>, transform_indices = @transform_15, window_bounds = array<i64: 2, 64, 1>}, {pipeline_mode = #tpu.pipeline_mode<synchronous>, transform_indices = @transform_16, window_bounds = array<i64: 8, 64>}, {pipeline_mode = #tpu.pipeline_mode<synchronous>, transform_indices = @transform_17, window_bounds = array<i64: 8, 1>}, {transform_indices = @transform_18, window_bounds = array<i64: 8, 128>}]} {
    %c0 = arith.constant 0 : index
    %c0_0 = arith.constant 0 : index
    %0 = vector.load %arg3[%c0, %c0_0] : memref<32x1xf32, #tpu.memory_space<vmem>>, vector<32x1xf32>
    %c0_1 = arith.constant 0 : index
    %c0_2 = arith.constant 0 : index
    %1 = vector.load %arg2[%c0_1, %c0_2] : memref<1x128xf32, #tpu.memory_space<vmem>>, vector<1x128xf32>
    %2 = vector.broadcast %0 : vector<32x1xf32> to vector<32x128xf32>
    %3 = vector.broadcast %1 : vector<1x128xf32> to vector<32x128xf32>
    %4 = arith.mulf %2, %3 : vector<32x128xf32>
    %c0_3 = arith.constant 0 : index
    %c0_4 = arith.constant 0 : index
    %5 = vector.load %arg4[%c0_3, %c0_4] : memref<32x1xf32, #tpu.memory_space<vmem>>, vector<32x1xf32>
    %6 = vector.broadcast %5 : vector<32x1xf32> to vector<32x128xf32>
    %7 = arith.addf %4, %6 : vector<32x128xf32>
    %cst = arith.constant 0.000000e+00 : f32
    %8 = vector.broadcast %cst : f32 to vector<32x128xf32>
    %9 = arith.subf %8, %7 : vector<32x128xf32>
    %10 = math.exp %9 : vector<32x128xf32>
    %cst_5 = arith.constant 1.000000e+00 : f32
    %11 = vector.broadcast %cst_5 : f32 to vector<32x128xf32>
    %12 = arith.addf %11, %10 : vector<32x128xf32>
    %13 = tpu.reciprocal %12 {approx = true} : vector<32x128xf32> -> vector<32x128xf32>
    %14 = arith.mulf %7, %13 : vector<32x128xf32>
    %c0_6 = arith.constant 0 : index
    %c0_7 = arith.constant 0 : index
    %15 = vector.load %arg5[%c0_6, %c0_7] : memref<32x32xf32, #tpu.memory_space<vmem>>, vector<32x32xf32>
    %cst_8 = arith.constant dense<0.000000e+00> : vector<32x128xf32>
    %16 = tpu.matmul %15, %14, %cst_8 {dimension_numbers = #tpu.dot_dimension_numbers<[1], [0], [0], [1], [0, 0, 1, 1], [], []>} : vector<32x32xf32>, vector<32x128xf32>, vector<32x128xf32> -> vector<32x128xf32>
    %c0_9 = arith.constant 0 : index
    %c0_10 = arith.constant 0 : index
    %17 = vector.load %arg6[%c0_9, %c0_10] : memref<32x1xf32, #tpu.memory_space<vmem>>, vector<32x1xf32>
    %18 = vector.broadcast %17 : vector<32x1xf32> to vector<32x128xf32>
    %19 = arith.addf %16, %18 : vector<32x128xf32>
    %cst_11 = arith.constant 0.000000e+00 : f32
    %20 = vector.broadcast %cst_11 : f32 to vector<32x128xf32>
    %21 = arith.subf %20, %19 : vector<32x128xf32>
    %22 = math.exp %21 : vector<32x128xf32>
    %cst_12 = arith.constant 1.000000e+00 : f32
    %23 = vector.broadcast %cst_12 : f32 to vector<32x128xf32>
    %24 = arith.addf %23, %22 : vector<32x128xf32>
    %25 = tpu.reciprocal %24 {approx = true} : vector<32x128xf32> -> vector<32x128xf32>
    %26 = arith.mulf %19, %25 : vector<32x128xf32>
    %c0_13 = arith.constant 0 : index
    %c0_14 = arith.constant 0 : index
    %27 = vector.load %arg7[%c0_13, %c0_14] : memref<64x4xf32, #tpu.memory_space<vmem>>, vector<64x4xf32>
    %c0_15 = arith.constant 0 : index
    %c0_16 = arith.constant 0 : index
    %28 = vector.load %arg1[%c0_15, %c0_16] : memref<4x128xf32, #tpu.memory_space<vmem>>, vector<4x128xf32>
    %cst_17 = arith.constant dense<0.000000e+00> : vector<64x128xf32>
    %29 = tpu.matmul %27, %28, %cst_17 {dimension_numbers = #tpu.dot_dimension_numbers<[1], [0], [0], [1], [0, 0, 1, 1], [], []>} : vector<64x4xf32>, vector<4x128xf32>, vector<64x128xf32> -> vector<64x128xf32>
    %c0_18 = arith.constant 0 : index
    %c0_19 = arith.constant 0 : index
    %30 = vector.load %arg8[%c0_18, %c0_19] : memref<64x1xf32, #tpu.memory_space<vmem>>, vector<64x1xf32>
    %31 = vector.broadcast %30 : vector<64x1xf32> to vector<64x128xf32>
    %32 = arith.addf %29, %31 : vector<64x128xf32>
    %c0_20 = arith.constant 0 : index
    %c0_21 = arith.constant 0 : index
    %33 = vector.load %arg9[%c0_20, %c0_21] : memref<64x1xf32, #tpu.memory_space<vmem>>, vector<64x1xf32>
    %c0_22 = arith.constant 0 : index
    %c0_23 = arith.constant 0 : index
    %34 = vector.load %arg10[%c0_22, %c0_23] : memref<64x1xf32, #tpu.memory_space<vmem>>, vector<64x1xf32>
    %cst_24 = arith.constant dense<0.000000e+00> : vector<128xf32>
    %35 = vector.multi_reduction <add>, %32, %cst_24 [0] : vector<64x128xf32> to vector<128xf32>
    %36 = vector.shape_cast %35 : vector<128xf32> to vector<1x128xf32>
    %cst_25 = arith.constant 6.400000e+01 : f32
    %37 = vector.broadcast %cst_25 : f32 to vector<1x128xf32>
    %38 = arith.divf %36, %37 : vector<1x128xf32>
    %39 = vector.broadcast %38 : vector<1x128xf32> to vector<64x128xf32>
    %40 = arith.subf %32, %39 : vector<64x128xf32>
    %41 = arith.mulf %40, %40 : vector<64x128xf32>
    %cst_26 = arith.constant dense<0.000000e+00> : vector<128xf32>
    %42 = vector.multi_reduction <add>, %41, %cst_26 [0] : vector<64x128xf32> to vector<128xf32>
    %43 = vector.shape_cast %42 : vector<128xf32> to vector<1x128xf32>
    %cst_27 = arith.constant 6.400000e+01 : f32
    %44 = vector.broadcast %cst_27 : f32 to vector<1x128xf32>
    %45 = arith.divf %43, %44 : vector<1x128xf32>
    %46 = vector.broadcast %38 : vector<1x128xf32> to vector<64x128xf32>
    %47 = arith.subf %32, %46 : vector<64x128xf32>
    %cst_28 = arith.constant 9.99999974E-6 : f32
    %48 = vector.broadcast %cst_28 : f32 to vector<1x128xf32>
    %49 = arith.addf %45, %48 : vector<1x128xf32>
    %50 = math.rsqrt %49 : vector<1x128xf32>
    %51 = vector.broadcast %50 : vector<1x128xf32> to vector<64x128xf32>
    %52 = arith.mulf %47, %51 : vector<64x128xf32>
    %53 = vector.broadcast %33 : vector<64x1xf32> to vector<64x128xf32>
    %54 = arith.mulf %52, %53 : vector<64x128xf32>
    %55 = vector.broadcast %34 : vector<64x1xf32> to vector<64x128xf32>
    %56 = arith.addf %54, %55 : vector<64x128xf32>
    %cst_29 = arith.constant 0.000000e+00 : f32
    %57 = vector.broadcast %cst_29 : f32 to vector<64x128xf32>
    %58 = arith.subf %57, %56 : vector<64x128xf32>
    %59 = math.exp %58 : vector<64x128xf32>
    %cst_30 = arith.constant 1.000000e+00 : f32
    %60 = vector.broadcast %cst_30 : f32 to vector<64x128xf32>
    %61 = arith.addf %60, %59 : vector<64x128xf32>
    %62 = tpu.reciprocal %61 {approx = true} : vector<64x128xf32> -> vector<64x128xf32>
    %63 = arith.mulf %56, %62 : vector<64x128xf32>
    %c0_31 = arith.constant 0 : index
    %c0_32 = arith.constant 0 : index
    %64 = vector.load %arg13[%c0_31, %c0_32] : memref<128x32xf32, #tpu.memory_space<vmem>>, vector<128x32xf32>
    %cst_33 = arith.constant dense<0.000000e+00> : vector<128x128xf32>
    %65 = tpu.matmul %64, %26, %cst_33 {dimension_numbers = #tpu.dot_dimension_numbers<[1], [0], [0], [1], [0, 0, 1, 1], [], []>} : vector<128x32xf32>, vector<32x128xf32>, vector<128x128xf32> -> vector<128x128xf32>
    %c0_34 = arith.constant 0 : index
    %c0_35 = arith.constant 0 : index
    %66 = vector.load %arg14[%c0_34, %c0_35] : memref<128x1xf32, #tpu.memory_space<vmem>>, vector<128x1xf32>
    %67 = vector.broadcast %66 : vector<128x1xf32> to vector<128x128xf32>
    %68 = arith.addf %65, %67 : vector<128x128xf32>
    %c0_36 = arith.constant 0 : index
    %c0_37 = arith.constant 0 : index
    %c0_38 = arith.constant 0 : index
    %69 = vector.load %arg11[%c0_36, %c0_37, %c0_38] : memref<2x64x64xf32, #tpu.memory_space<vmem>>, vector<1x64x64xf32>
    %70 = vector.shape_cast %69 : vector<1x64x64xf32> to vector<64x64xf32>
    %cst_39 = arith.constant dense<0.000000e+00> : vector<64x128xf32>
    %71 = tpu.matmul %70, %63, %cst_39 {dimension_numbers = #tpu.dot_dimension_numbers<[1], [0], [0], [1], [0, 0, 1, 1], [], []>} : vector<64x64xf32>, vector<64x128xf32>, vector<64x128xf32> -> vector<64x128xf32>
    %c0_40 = arith.constant 0 : index
    %c0_41 = arith.constant 0 : index
    %c0_42 = arith.constant 0 : index
    %72 = vector.load %arg12[%c0_40, %c0_41, %c0_42] : memref<2x64x1xf32, #tpu.memory_space<vmem>>, vector<1x64x1xf32>
    %73 = vector.shape_cast %72 : vector<1x64x1xf32> to vector<64x1xf32>
    %74 = vector.broadcast %73 : vector<64x1xf32> to vector<64x128xf32>
    %75 = arith.addf %71, %74 : vector<64x128xf32>
    %76 = vector.extract_strided_slice %68 {offsets = [0, 0], sizes = [64, 128], strides = [1, 1]} : vector<128x128xf32> to vector<64x128xf32>
    %77 = arith.addf %75, %76 : vector<64x128xf32>
    %c0_43 = arith.constant 0 : index
    %c0_44 = arith.constant 0 : index
    %c0_45 = arith.constant 0 : index
    %78 = vector.load %arg15[%c0_43, %c0_44, %c0_45] : memref<2x64x1xf32, #tpu.memory_space<vmem>>, vector<1x64x1xf32>
    %79 = vector.shape_cast %78 : vector<1x64x1xf32> to vector<64x1xf32>
    %c0_46 = arith.constant 0 : index
    %c0_47 = arith.constant 0 : index
    %c0_48 = arith.constant 0 : index
    %80 = vector.load %arg16[%c0_46, %c0_47, %c0_48] : memref<2x64x1xf32, #tpu.memory_space<vmem>>, vector<1x64x1xf32>
    %81 = vector.shape_cast %80 : vector<1x64x1xf32> to vector<64x1xf32>
    %cst_49 = arith.constant dense<0.000000e+00> : vector<128xf32>
    %82 = vector.multi_reduction <add>, %77, %cst_49 [0] : vector<64x128xf32> to vector<128xf32>
    %83 = vector.shape_cast %82 : vector<128xf32> to vector<1x128xf32>
    %cst_50 = arith.constant 6.400000e+01 : f32
    %84 = vector.broadcast %cst_50 : f32 to vector<1x128xf32>
    %85 = arith.divf %83, %84 : vector<1x128xf32>
    %86 = vector.broadcast %85 : vector<1x128xf32> to vector<64x128xf32>
    %87 = arith.subf %77, %86 : vector<64x128xf32>
    %88 = arith.mulf %87, %87 : vector<64x128xf32>
    %cst_51 = arith.constant dense<0.000000e+00> : vector<128xf32>
    %89 = vector.multi_reduction <add>, %88, %cst_51 [0] : vector<64x128xf32> to vector<128xf32>
    %90 = vector.shape_cast %89 : vector<128xf32> to vector<1x128xf32>
    %cst_52 = arith.constant 6.400000e+01 : f32
    %91 = vector.broadcast %cst_52 : f32 to vector<1x128xf32>
    %92 = arith.divf %90, %91 : vector<1x128xf32>
    %93 = vector.broadcast %85 : vector<1x128xf32> to vector<64x128xf32>
    %94 = arith.subf %77, %93 : vector<64x128xf32>
    %cst_53 = arith.constant 9.99999974E-6 : f32
    %95 = vector.broadcast %cst_53 : f32 to vector<1x128xf32>
    %96 = arith.addf %92, %95 : vector<1x128xf32>
    %97 = math.rsqrt %96 : vector<1x128xf32>
    %98 = vector.broadcast %97 : vector<1x128xf32> to vector<64x128xf32>
    %99 = arith.mulf %94, %98 : vector<64x128xf32>
    %100 = vector.broadcast %79 : vector<64x1xf32> to vector<64x128xf32>
    %101 = arith.mulf %99, %100 : vector<64x128xf32>
    %102 = vector.broadcast %81 : vector<64x1xf32> to vector<64x128xf32>
    %103 = arith.addf %101, %102 : vector<64x128xf32>
    %cst_54 = arith.constant 0.000000e+00 : f32
    %104 = vector.broadcast %cst_54 : f32 to vector<64x128xf32>
    %105 = arith.subf %104, %103 : vector<64x128xf32>
    %106 = math.exp %105 : vector<64x128xf32>
    %cst_55 = arith.constant 1.000000e+00 : f32
    %107 = vector.broadcast %cst_55 : f32 to vector<64x128xf32>
    %108 = arith.addf %107, %106 : vector<64x128xf32>
    %109 = tpu.reciprocal %108 {approx = true} : vector<64x128xf32> -> vector<64x128xf32>
    %110 = arith.mulf %103, %109 : vector<64x128xf32>
    %111 = arith.addf %63, %110 : vector<64x128xf32>
    %c1 = arith.constant 1 : index
    %c0_56 = arith.constant 0 : index
    %c0_57 = arith.constant 0 : index
    %112 = vector.load %arg11[%c1, %c0_56, %c0_57] : memref<2x64x64xf32, #tpu.memory_space<vmem>>, vector<1x64x64xf32>
    %113 = vector.shape_cast %112 : vector<1x64x64xf32> to vector<64x64xf32>
    %cst_58 = arith.constant dense<0.000000e+00> : vector<64x128xf32>
    %114 = tpu.matmul %113, %111, %cst_58 {dimension_numbers = #tpu.dot_dimension_numbers<[1], [0], [0], [1], [0, 0, 1, 1], [], []>} : vector<64x64xf32>, vector<64x128xf32>, vector<64x128xf32> -> vector<64x128xf32>
    %c1_59 = arith.constant 1 : index
    %c0_60 = arith.constant 0 : index
    %c0_61 = arith.constant 0 : index
    %115 = vector.load %arg12[%c1_59, %c0_60, %c0_61] : memref<2x64x1xf32, #tpu.memory_space<vmem>>, vector<1x64x1xf32>
    %116 = vector.shape_cast %115 : vector<1x64x1xf32> to vector<64x1xf32>
    %117 = vector.broadcast %116 : vector<64x1xf32> to vector<64x128xf32>
    %118 = arith.addf %114, %117 : vector<64x128xf32>
    %119 = vector.extract_strided_slice %68 {offsets = [64, 0], sizes = [64, 128], strides = [1, 1]} : vector<128x128xf32> to vector<64x128xf32>
    %120 = arith.addf %118, %119 : vector<64x128xf32>
    %c1_62 = arith.constant 1 : index
    %c0_63 = arith.constant 0 : index
    %c0_64 = arith.constant 0 : index
    %121 = vector.load %arg15[%c1_62, %c0_63, %c0_64] : memref<2x64x1xf32, #tpu.memory_space<vmem>>, vector<1x64x1xf32>
    %122 = vector.shape_cast %121 : vector<1x64x1xf32> to vector<64x1xf32>
    %c1_65 = arith.constant 1 : index
    %c0_66 = arith.constant 0 : index
    %c0_67 = arith.constant 0 : index
    %123 = vector.load %arg16[%c1_65, %c0_66, %c0_67] : memref<2x64x1xf32, #tpu.memory_space<vmem>>, vector<1x64x1xf32>
    %124 = vector.shape_cast %123 : vector<1x64x1xf32> to vector<64x1xf32>
    %cst_68 = arith.constant dense<0.000000e+00> : vector<128xf32>
    %125 = vector.multi_reduction <add>, %120, %cst_68 [0] : vector<64x128xf32> to vector<128xf32>
    %126 = vector.shape_cast %125 : vector<128xf32> to vector<1x128xf32>
    %cst_69 = arith.constant 6.400000e+01 : f32
    %127 = vector.broadcast %cst_69 : f32 to vector<1x128xf32>
    %128 = arith.divf %126, %127 : vector<1x128xf32>
    %129 = vector.broadcast %128 : vector<1x128xf32> to vector<64x128xf32>
    %130 = arith.subf %120, %129 : vector<64x128xf32>
    %131 = arith.mulf %130, %130 : vector<64x128xf32>
    %cst_70 = arith.constant dense<0.000000e+00> : vector<128xf32>
    %132 = vector.multi_reduction <add>, %131, %cst_70 [0] : vector<64x128xf32> to vector<128xf32>
    %133 = vector.shape_cast %132 : vector<128xf32> to vector<1x128xf32>
    %cst_71 = arith.constant 6.400000e+01 : f32
    %134 = vector.broadcast %cst_71 : f32 to vector<1x128xf32>
    %135 = arith.divf %133, %134 : vector<1x128xf32>
    %136 = vector.broadcast %128 : vector<1x128xf32> to vector<64x128xf32>
    %137 = arith.subf %120, %136 : vector<64x128xf32>
    %cst_72 = arith.constant 9.99999974E-6 : f32
    %138 = vector.broadcast %cst_72 : f32 to vector<1x128xf32>
    %139 = arith.addf %135, %138 : vector<1x128xf32>
    %140 = math.rsqrt %139 : vector<1x128xf32>
    %141 = vector.broadcast %140 : vector<1x128xf32> to vector<64x128xf32>
    %142 = arith.mulf %137, %141 : vector<64x128xf32>
    %143 = vector.broadcast %122 : vector<64x1xf32> to vector<64x128xf32>
    %144 = arith.mulf %142, %143 : vector<64x128xf32>
    %145 = vector.broadcast %124 : vector<64x1xf32> to vector<64x128xf32>
    %146 = arith.addf %144, %145 : vector<64x128xf32>
    %cst_73 = arith.constant 0.000000e+00 : f32
    %147 = vector.broadcast %cst_73 : f32 to vector<64x128xf32>
    %148 = arith.subf %147, %146 : vector<64x128xf32>
    %149 = math.exp %148 : vector<64x128xf32>
    %cst_74 = arith.constant 1.000000e+00 : f32
    %150 = vector.broadcast %cst_74 : f32 to vector<64x128xf32>
    %151 = arith.addf %150, %149 : vector<64x128xf32>
    %152 = tpu.reciprocal %151 {approx = true} : vector<64x128xf32> -> vector<64x128xf32>
    %153 = arith.mulf %146, %152 : vector<64x128xf32>
    %154 = arith.addf %111, %153 : vector<64x128xf32>
    %c0_75 = arith.constant 0 : index
    %c0_76 = arith.constant 0 : index
    %155 = vector.load %arg17[%c0_75, %c0_76] : memref<8x64xf32, #tpu.memory_space<vmem>>, vector<8x64xf32>
    %cst_77 = arith.constant dense<0.000000e+00> : vector<8x128xf32>
    %156 = tpu.matmul %155, %154, %cst_77 {dimension_numbers = #tpu.dot_dimension_numbers<[1], [0], [0], [1], [0, 0, 1, 1], [], []>} : vector<8x64xf32>, vector<64x128xf32>, vector<8x128xf32> -> vector<8x128xf32>
    %c0_78 = arith.constant 0 : index
    %c0_79 = arith.constant 0 : index
    %157 = vector.load %arg18[%c0_78, %c0_79] : memref<8x1xf32, #tpu.memory_space<vmem>>, vector<8x1xf32>
    %158 = vector.broadcast %157 : vector<8x1xf32> to vector<8x128xf32>
    %159 = arith.addf %156, %158 : vector<8x128xf32>
    %cst_80 = arith.constant 1.000000e+00 : f32
    %160 = vector.broadcast %cst_80 : f32 to vector<8x128xf32>
    %161 = arith.mulf %160, %159 : vector<8x128xf32>
    %cst_81 = arith.constant 2.000000e+01 : f32
    %162 = vector.broadcast %cst_81 : f32 to vector<8x128xf32>
    %163 = arith.minimumf %161, %162 : vector<8x128xf32>
    %164 = math.exp %163 : vector<8x128xf32>
    %165 = math.log1p %164 : vector<8x128xf32>
    %cst_82 = arith.constant 1.000000e+00 : f32
    %166 = vector.broadcast %cst_82 : f32 to vector<8x128xf32>
    %167 = arith.divf %165, %166 : vector<8x128xf32>
    %cst_83 = arith.constant 2.000000e+01 : f32
    %168 = vector.broadcast %cst_83 : f32 to vector<8x128xf32>
    %169 = arith.cmpf ogt, %161, %168 : vector<8x128xf32>
    %170 = arith.select %169, %159, %167 : vector<8x128xi1>, vector<8x128xf32>
    %c0_84 = arith.constant 0 : index
    %c0_85 = arith.constant 0 : index
    %171 = vector.load %arg19[%c0_84, %c0_85] : memref<8x128xf32, #tpu.memory_space<vmem>>, vector<8x128xf32>
    tpu.vector_store %arg19[%c0_84, %c0_85], %170 {strides = array<i32>} : memref<8x128xf32, #tpu.memory_space<vmem>>, vector<8x128xf32>,
    return
  }
  func.func @transform_0(%arg0: i32) -> (i32, i32) {
    %c0_i32 = arith.constant 0 : i32
    %c0_i32_0 = arith.constant 0 : i32
    return %c0_i32, %arg0 : i32, i32
  }
  func.func @transform_1(%arg0: i32) -> (i32, i32) {
    %c0_i32 = arith.constant 0 : i32
    %c0_i32_0 = arith.constant 0 : i32
    return %c0_i32, %arg0 : i32, i32
  }
  func.func @transform_2(%arg0: i32) -> (i32, i32) {
    %c0_i32 = arith.constant 0 : i32
    %c0_i32_0 = arith.constant 0 : i32
    %c0_i32_1 = arith.constant 0 : i32
    return %c0_i32, %c0_i32_0 : i32, i32
  }
  func.func @transform_3(%arg0: i32) -> (i32, i32) {
    %c0_i32 = arith.constant 0 : i32
    %c0_i32_0 = arith.constant 0 : i32
    %c0_i32_1 = arith.constant 0 : i32
    return %c0_i32, %c0_i32_0 : i32, i32
  }
  func.func @transform_4(%arg0: i32) -> (i32, i32) {
    %c0_i32 = arith.constant 0 : i32
    %c0_i32_0 = arith.constant 0 : i32
    %c0_i32_1 = arith.constant 0 : i32
    return %c0_i32, %c0_i32_0 : i32, i32
  }
  func.func @transform_5(%arg0: i32) -> (i32, i32) {
    %c0_i32 = arith.constant 0 : i32
    %c0_i32_0 = arith.constant 0 : i32
    %c0_i32_1 = arith.constant 0 : i32
    return %c0_i32, %c0_i32_0 : i32, i32
  }
  func.func @transform_6(%arg0: i32) -> (i32, i32) {
    %c0_i32 = arith.constant 0 : i32
    %c0_i32_0 = arith.constant 0 : i32
    %c0_i32_1 = arith.constant 0 : i32
    return %c0_i32, %c0_i32_0 : i32, i32
  }
  func.func @transform_7(%arg0: i32) -> (i32, i32) {
    %c0_i32 = arith.constant 0 : i32
    %c0_i32_0 = arith.constant 0 : i32
    %c0_i32_1 = arith.constant 0 : i32
    return %c0_i32, %c0_i32_0 : i32, i32
  }
  func.func @transform_8(%arg0: i32) -> (i32, i32) {
    %c0_i32 = arith.constant 0 : i32
    %c0_i32_0 = arith.constant 0 : i32
    %c0_i32_1 = arith.constant 0 : i32
    return %c0_i32, %c0_i32_0 : i32, i32
  }
  func.func @transform_9(%arg0: i32) -> (i32, i32) {
    %c0_i32 = arith.constant 0 : i32
    %c0_i32_0 = arith.constant 0 : i32
    %c0_i32_1 = arith.constant 0 : i32
    return %c0_i32, %c0_i32_0 : i32, i32
  }
  func.func @transform_10(%arg0: i32) -> (i32, i32, i32) {
    %c0_i32 = arith.constant 0 : i32
    %c0_i32_0 = arith.constant 0 : i32
    %c0_i32_1 = arith.constant 0 : i32
    %c0_i32_2 = arith.constant 0 : i32
    return %c0_i32, %c0_i32_0, %c0_i32_1 : i32, i32, i32
  }
  func.func @transform_11(%arg0: i32) -> (i32, i32, i32) {
    %c0_i32 = arith.constant 0 : i32
    %c0_i32_0 = arith.constant 0 : i32
    %c0_i32_1 = arith.constant 0 : i32
    %c0_i32_2 = arith.constant 0 : i32
    return %c0_i32, %c0_i32_0, %c0_i32_1 : i32, i32, i32
  }
  func.func @transform_12(%arg0: i32) -> (i32, i32) {
    %c0_i32 = arith.constant 0 : i32
    %c0_i32_0 = arith.constant 0 : i32
    %c0_i32_1 = arith.constant 0 : i32
    return %c0_i32, %c0_i32_0 : i32, i32
  }
  func.func @transform_13(%arg0: i32) -> (i32, i32) {
    %c0_i32 = arith.constant 0 : i32
    %c0_i32_0 = arith.constant 0 : i32
    %c0_i32_1 = arith.constant 0 : i32
    return %c0_i32, %c0_i32_0 : i32, i32
  }
  func.func @transform_14(%arg0: i32) -> (i32, i32, i32) {
    %c0_i32 = arith.constant 0 : i32
    %c0_i32_0 = arith.constant 0 : i32
    %c0_i32_1 = arith.constant 0 : i32
    %c0_i32_2 = arith.constant 0 : i32
    return %c0_i32, %c0_i32_0, %c0_i32_1 : i32, i32, i32
  }
  func.func @transform_15(%arg0: i32) -> (i32, i32, i32) {
    %c0_i32 = arith.constant 0 : i32
    %c0_i32_0 = arith.constant 0 : i32
    %c0_i32_1 = arith.constant 0 : i32
    %c0_i32_2 = arith.constant 0 : i32
    return %c0_i32, %c0_i32_0, %c0_i32_1 : i32, i32, i32
  }
  func.func @transform_16(%arg0: i32) -> (i32, i32) {
    %c0_i32 = arith.constant 0 : i32
    %c0_i32_0 = arith.constant 0 : i32
    %c0_i32_1 = arith.constant 0 : i32
    return %c0_i32, %c0_i32_0 : i32, i32
  }
  func.func @transform_17(%arg0: i32) -> (i32, i32) {
    %c0_i32 = arith.constant 0 : i32
    %c0_i32_0 = arith.constant 0 : i32
    %c0_i32_1 = arith.constant 0 : i32
    return %c0_i32, %c0_i32_0 : i32, i32
  }
  func.func @transform_18(%arg0: i32) -> (i32, i32) {
    %c0_i32 = arith.constant 0 : i32
    %c0_i32_0 = arith.constant 0 : i32
    return %c0_i32, %arg0 : i32, i32
  }
}

</mosaic_0001>

<bundles_post_ra>
// kernel: mlp_model_forward.1
= control target key start
LH: loop header
LB: loop body
LE: loop exit
PB: predicated region body
PF: predicated region fallthrough
CT: control target
= control target key end

     0   :  { %s2678_s0 = inlined_call_operand.vmem [shape: f32[4,128], index: 0, kind: input, shape index: {}]   ;;  %s2679_s1 = inlined_call_operand.vmem [shape: f32[1,128], index: 1, kind: input, shape index: {}]   ;;  %s2680_s2 = inlined_call_operand.vmem [shape: f32[32,1], index: 2, kind: input, shape index: {}]   ;;  %s2681_s3 = inlined_call_operand.vmem [shape: f32[32,1], index: 3, kind: input, shape index: {}]   ;;  %s2682_s4 = inlined_call_operand.vmem [shape: f32[32,32], index: 4, kind: input, shape index: {}]   ;;  %s2683_s5 = inlined_call_operand.vmem [shape: f32[32,1], index: 5, kind: input, shape index: {}]   ;;  %s2684_s6 = inlined_call_operand.vmem [shape: f32[64,4], index: 6, kind: input, shape index: {}]   ;;  %s2685_s7 = inlined_call_operand.vmem [shape: f32[64,1], index: 7, kind: input, shape index: {}]   ;;  %s2686_s8 = inlined_call_operand.vmem [shape: f32[64,1], index: 8, kind: input, shape index: {}]   ;;  %s2687_s9 = inlined_call_operand.vmem [shape: f32[64,1], index: 9, kind: input, shape index: {}]   ;;  %s2688_s10 = inlined_call_operand.vmem [shape: f32[2,64,64], index: 10, kind: input, shape index: {}]   ;;  %s2689_s11 = inlined_call_operand.vmem [shape: f32[2,64,1], index: 11, kind: input, shape index: {}]   ;;  %s2690_s12 = inlined_call_operand.vmem [shape: f32[128,32], index: 12, kind: input, shape index: {}]   ;;  %s2691_s13 = inlined_call_operand.vmem [shape: f32[128,1], index: 13, kind: input, shape index: {}]   ;;  %s2692_s14 = inlined_call_operand.vmem [shape: f32[2,64,1], index: 14, kind: input, shape index: {}]   ;;  %s2693_s15 = inlined_call_operand.vmem [shape: f32[2,64,1], index: 15, kind: input, shape index: {}]   ;;  %s2694_s16 = inlined_call_operand.vmem [shape: f32[8,64], index: 16, kind: input, shape index: {}]   ;;  %s2695_s17 = inlined_call_operand.vmem [shape: f32[8,1], index: 17, kind: input, shape index: {}]   ;;  %s2696_s18 = inlined_call_operand.hbm [shape: f32[8,128], index: 18, kind: output, shape index: {}]  }
   0x1   :  { %2698 = sst [smem:[#allocation5_spill]] %s2678_s0 }
   0x2   :  { %2699 = sst [smem:[#allocation6_spill]] %s2679_s1 }
   0x3   :  { %2700 = sst [smem:[#allocation7_spill]] %s2680_s2 }
   0x4   :  { %s2701_s29 = sld [smem:[#allocation5_spill]]  ;;  %vm320_vm0 = vcmask 1043456   ;;  %v238_v1 = vld [vmem:[%s2684_s6] sm:$0xff]  ;;  %vm295_vm1 = vcmask 31744   ;;  %v1869_v2 = vmov 0   ;;  %v94_v3 = vld [vmem:[%s2681_s3 + $0x10] sm:$0xff] }
   0x5   :  { %1701 = vset.pattern.permute.xlu2 %v1869_v2  ;;  %v95_v4 = vld [vmem:[%s2681_s3 + $0x18] sm:$0xff]  ;;  %s2702_s23 = sld [smem:[#allocation7_spill]]  ;;  %1700 = vset.pattern.permute.xlu1 %v1869_v2  ;;  %v239_v6 = vld [vmem:[%s2684_s6 + $0x8] sm:$0xff] }
   0x6   :  { %1699 = vset.pattern.permute.xlu0 %v1869_v2  ;;  %108 = vperm.xlu2 %1701, %v94_v3  }
   0x7   :  { %113 = vperm.xlu1 %1700, %v95_v4  }
   0xa   :  { %v246_v0 = vld [vmem:[%s2701_s29] sm:$0xf] }
   0xb   :  { %1610 = vmatpush.msk.msra.mxu1 %vm320_vm0, %v246_v0  ;;  %v63_v5 = vld [vmem:[%s2702_s23 + $0x18] sm:$0xff]  ;;  %v60_v7 = vld [vmem:[%s2702_s23] sm:$0xff] }
   0xc   :  { %1611 = vmatmul.msk.f32.vlgmr.msra.gmra.mxu1 %vm295_vm1, %v238_v1  ;;  %82 = vperm.xlu0 %1699, %v63_v5  }
   0xd   :  { %23 = vsyncpa [#allocation3], 0  ;;  %v62_v8 = vld [vmem:[%s2702_s23 + $0x10] sm:$0xff]  ;;  %v61_v9 = vld [vmem:[%s2702_s23 + $0x8] sm:$0xff]  ;;  %s2703_s1 = sld [smem:[#allocation6_spill]]  ;;  %vm172_vm2 = vcmask 261120  }
   0xe   :  { %67 = vperm.xlu2 %1701, %v60_v7   ;;  %v240_v10 = vld [vmem:[%s2684_s6 + $0x10] sm:$0xff]  ;;  %v247_v11 = vld [vmem:[%s2685_s7] sm:$0xff]  ;;  %v93_v12 = vld [vmem:[%s2681_s3 + $0x8] sm:$0xff]  ;;  %vm876_vm7 = vcmask 523264   ;;  %s1871_s30 = smov [#allocation2]   ;;  %s1597_s19 = sshll.u32 %s2696_s18, 4  ;;  %s1598_s19 = int_to_ptr.hbm [resolvable:$true] %s1597_s19 }
   0xf   :  { %72 = vperm.xlu1 %1700, %v61_v9   ;;  %v92_v13 = vld [vmem:[%s2681_s3] sm:$0xff]  ;;  %v241_v14 = vld [vmem:[%s2684_s6 + $0x18] sm:$0xff]  ;;  %v248_v16 = vld [vmem:[%s2685_s7 + $0x8] sm:$0xff]  ;;  %s1595_s0 = sshll.u32 %s1871_s30, 4  ;;  %s1596_s0 = int_to_ptr.vmem [resolvable:$true] %s1595_s0 }
  0x10   :  { %v250_v15 = vld [vmem:[%s2685_s7 + $0x18] sm:$0xff]  ;;  %v249_v17 = vld [vmem:[%s2685_s7 + $0x10] sm:$0xff]  ;;  %v242_v18 = vld [vmem:[%s2684_s6 + $0x20] sm:$0xff] }
  0x11   :  { %v253_v19 = vld [vmem:[%s2685_s7 + $0x30] sm:$0xff]  ;;  %v251_v20 = vld [vmem:[%s2685_s7 + $0x20] sm:$0xff]  ;;  %v252_v21 = vld [vmem:[%s2685_s7 + $0x28] sm:$0xff] }
  0x12   :  { %v243_v22 = vld [vmem:[%s2684_s6 + $0x28] sm:$0xff]  ;;  %v150_v23 = vld [vmem:[%s2683_s5 + $0x10] sm:$0xff]  ;;  %v254_v24 = vld [vmem:[%s2685_s7 + $0x38] sm:$0xff] }
  0x13   :  { %v151_v25 = vld [vmem:[%s2683_s5 + $0x18] sm:$0xff]  ;;  %v244_v26 = vld [vmem:[%s2684_s6 + $0x30] sm:$0xff]  ;;  %v149_v28 = vld [vmem:[%s2683_s5 + $0x8] sm:$0xff] }
  0x14   :  { %1612 = vmatmul.msk.f32.gmra.mxu1 %vm295_vm1, %v239_v6  ;;  %77 = vperm.xlu0 %1699, %v62_v8   ;;  %v372_v27 = vld [vmem:[%s2686_s8 + $0x38] sm:$0xff]  ;;  %v148_v29 = vld [vmem:[%s2683_s5] sm:$0xff]  ;;  %v370_v31 = vld [vmem:[%s2686_s8 + $0x28] sm:$0xff] }
  0x15   :  { %v245_v30 = vld [vmem:[%s2684_s6 + $0x38] sm:$0xff]  ;;  %v371_v32 = vld [vmem:[%s2686_s8 + $0x30] sm:$0xff]  ;;  %v378_v34 = vld [vmem:[%s2687_s9 + $0x28] sm:$0xff] }
  0x16   :  { %257 = vperm.xlu2 %1701, %v247_v11   ;;  %v380_v33 = vld [vmem:[%s2687_s9 + $0x38] sm:$0xff]  ;;  %v379_v35 = vld [vmem:[%s2687_s9 + $0x30] sm:$0xff]  ;;  %v369_v36 = vld [vmem:[%s2686_s8 + $0x20] sm:$0xff] }
  0x17   :  { %98 = vperm.xlu1 %1700, %v92_v13   ;;  %v367_v37 = vld [vmem:[%s2686_s8 + $0x10] sm:$0xff]  ;;  %v368_v38 = vld [vmem:[%s2686_s8 + $0x18] sm:$0xff]  ;;  %v377_v39 = vld [vmem:[%s2687_s9 + $0x20] sm:$0xff] }
  0x18   :  { %v375_v40 = vld [vmem:[%s2687_s9 + $0x10] sm:$0xff]  ;;  %v376_v41 = vld [vmem:[%s2687_s9 + $0x18] sm:$0xff]  ;;  %v366_v42 = vld [vmem:[%s2686_s8 + $0x8] sm:$0xff] }
  0x19   :  { %v373_v43 = vld [vmem:[%s2687_s9] sm:$0xff]  ;;  %v374_v45 = vld [vmem:[%s2687_s9 + $0x8] sm:$0xff]  ;;  %v830_v49 = vld [vmem:[%s2689_s11 + $0x10] sm:$0xff] }
  0x1a   :  { %v365_v44 = vld [vmem:[%s2686_s8] sm:$0xff]  ;;  %v612_v48 = vld [vmem:[%s2691_s13 + $0x8] sm:$0xff]  ;;  %v613_v51 = vld [vmem:[%s2691_s13 + $0x10] sm:$0xff] }
  0x1b   :  { %v828_v46 = vld [vmem:[%s2689_s11] sm:$0xff]  ;;  %v829_v50 = vld [vmem:[%s2689_s11 + $0x8] sm:$0xff]  ;;  %v614_v53 = vld [vmem:[%s2691_s13 + $0x18] sm:$0xff] }
  0x1c   :  { %1613 = vmatmul.msk.f32.gmra.mxu1 %vm295_vm1, %v240_v10  ;;  %103 = vperm.xlu0 %1699, %v93_v12   ;;  %v611_v47 = vld [vmem:[%s2691_s13] sm:$0xff]  ;;  %v831_v54 = vld [vmem:[%s2689_s11 + $0x18] sm:$0xff]  ;;  %v833_v59 = vld [vmem:[%s2689_s11 + $0x28] sm:$0xff] }
  0x1d   :  { %v615_v52 = vld [vmem:[%s2691_s13 + $0x20] sm:$0xff]  ;;  %v616_v62 = vld [vmem:[%s2691_s13 + $0x28] sm:$0xff]  ;;  %v618_v6 = vld [vmem:[%s2691_s13 + $0x38] sm:$0xff] }
  0x1e   :  { %272 = vperm.xlu2 %1701, %v250_v15   ;;  %v1702_v55 = vld [vmem:[%s2703_s1] ss:$0 sm:$0xff]  ;;  %v617_v8 = vld [vmem:[%s2691_s13 + $0x30] sm:$0xff] }
  0x1f   :  { %267 = vperm.xlu1 %1700, %v249_v17   ;;  %v832_v61 = vld [vmem:[%s2689_s11 + $0x20] sm:$0xff]  ;;  %v834_v9 = vld [vmem:[%s2689_s11 + $0x30] sm:$0xff] }
  0x24   :  { %1614 = vmatmul.msk.f32.gmra.mxu1 %vm295_vm1, %v241_v14  ;;  %262 = vperm.xlu0 %1699, %v248_v16  }
  0x26   :  { %287 = vperm.xlu2 %1701, %v253_v19  }
  0x27   :  { %282 = vperm.xlu1 %1700, %v252_v21  }
  0x2c   :  { %1615 = vmatmul.msk.f32.gmra.mxu1 %vm295_vm1, %v242_v18  ;;  %277 = vperm.xlu0 %1699, %v251_v20  }
  0x2e   :  { %164 = vperm.xlu2 %1701, %v150_v23  }
  0x2f   :  { %169 = vperm.xlu1 %1700, %v151_v25   ;;  %v835_v25 = vld [vmem:[%s2689_s11 + $0x38] sm:$0xff] }
  0x34   :  { %1616 = vmatmul.msk.f32.gmra.mxu1 %vm295_vm1, %v243_v22  ;;  %292 = vperm.xlu0 %1699, %v254_v24   ;;  %v956_v22 = vld [vmem:[%s2692_s14 + $0x30] sm:$0xff] }
  0x36   :  { %488 = vperm.xlu2 %1701, %v372_v27  }
  0x37   :  { %154 = vperm.xlu1 %1700, %v148_v29  }
  0x3c   :  { %1617 = vmatmul.msk.f32.gmra.mxu1 %vm295_vm1, %v244_v26  ;;  %159 = vperm.xlu0 %1699, %v149_v28   ;;  %v957_v26 = vld [vmem:[%s2692_s14 + $0x38] sm:$0xff] }
  0x3e   :  { %478 = vperm.xlu2 %1701, %v370_v31  }
  0x3f   :  { %536 = vperm.xlu1 %1700, %v380_v33  }
  0x44   :  { %1618 = vmatmul.msk.f32.gmra.mxu1 %vm295_vm1, %v245_v30  ;;  %483 = vperm.xlu0 %1699, %v371_v32  }
  0x46   :  { %526 = vperm.xlu2 %1701, %v378_v34   ;;  %v964_v34 = vld [vmem:[%s2693_s15 + $0x30] sm:$0xff] }
  0x47   :  { %473 = vperm.xlu1 %1700, %v369_v36   ;;  %v955_v36 = vld [vmem:[%s2692_s14 + $0x28] sm:$0xff] }
  0x4c   :  { %531 = vperm.xlu0 %1699, %v379_v35   ;;  %v965_v35 = vld [vmem:[%s2693_s15 + $0x38] sm:$0xff] }
  0x4e   :  { %463 = vperm.xlu2 %1701, %v367_v37  }
  0x4f   :  { %521 = vperm.xlu1 %1700, %v377_v39  }
  0x54   :  { %468 = vperm.xlu0 %1699, %v368_v38  }
  0x56   :  { %511 = vperm.xlu2 %1701, %v375_v40  }
  0x57   :  { %458 = vperm.xlu1 %1700, %v366_v42  }
  0x5c   :  { %516 = vperm.xlu0 %1699, %v376_v41  }
  0x5e   :  { %501 = vperm.xlu2 %1701, %v373_v43  }
  0x5f   :  { %506 = vperm.xlu1 %1700, %v374_v45   ;;  %v954_v45 = vld [vmem:[%s2692_s14 + $0x20] sm:$0xff] }
  0x60   :  { %v109_v63 = vpop.permute.xlu2 %108 }
  0x64   :  { %453 = vperm.xlu0 %1699, %v365_v44   ;;  %v953_v44 = vld [vmem:[%s2692_s14 + $0x18] sm:$0xff] }
  0x66   :  { %838 = vperm.xlu2 %1701, %v828_v46   ;;  %v963_v46 = vld [vmem:[%s2693_s15 + $0x28] sm:$0xff] }
  0x67   :  { %634 = vperm.xlu1 %1700, %v612_v48  }
  0x68   :  { %v68_v11 = vpop.permute.xlu2 %67 }
  0x69   :  { %v88_v13 = vmul.f32 %v1702_v55, %v68_v11 }
  0x6c   :  { %629 = vperm.xlu0 %1699, %v611_v47  }
  0x6e   :  { %848 = vperm.xlu2 %1701, %v830_v49  }
  0x6f   :  { %639 = vperm.xlu1 %1700, %v613_v51   ;;  %v144_v51 = vld [vmem:[%s2682_s4] sm:$0xff] }
  0x74   :  { %843 = vperm.xlu0 %1699, %v829_v50  }
  0x76   :  { %649 = vperm.xlu2 %1701, %v615_v52   ;;  %v147_v52 = vld [vmem:[%s2682_s4 + $0x18] sm:$0xff] }
  0x77   :  { %853 = vperm.xlu1 %1700, %v831_v54  }
  0x79   :  { %v114_v56 = vpop.permute.xlu1 %113 }
  0x7c   :  { %644 = vperm.xlu0 %1699, %v614_v53   ;;  %v258_v53 = vpop.permute.xlu2 %257 }
  0x7e   :  { %v83_v57 = vpop.permute.xlu0 %82  ;;  %863 = vperm.xlu2 %1701, %v833_v59   ;;  %v145_v59 = vld [vmem:[%s2682_s4 + $0x8] sm:$0xff] }
  0x7f   :  { %v91_v58 = vmul.f32 %v1702_v55, %v83_v57  ;;  %654 = vperm.xlu1 %1700, %v616_v62   ;;  %v952_v57 = vld [vmem:[%s2692_s14 + $0x10] sm:$0xff]  ;;  %v950_v62 = vld [vmem:[%s2692_s14] sm:$0xff] }
  0x81   :  { %v119_v60 = vadd.f32 %v114_v56, %v91_v58  ;;  %v73_v3 = vpop.permute.xlu1 %72  ;;  %v962_v56 = vld [vmem:[%s2693_s15 + $0x20] sm:$0xff] }
  0x82   :  { %v89_v15 = vmul.f32 %v1702_v55, %v73_v3 }
  0x83   :  { %v123_v0 = vsub.f32 0.0, %v119_v60 }
  0x84   :  { %858 = vperm.xlu0 %1699, %v832_v61  }
  0x85   :  { %v130_v1 = vmul.f32 1.442695, %v123_v0  ;;  %v951_v0 = vld [vmem:[%s2692_s14 + $0x8] sm:$0xff] }
  0x86   :  { %v78_v2 = vpop.permute.xlu0 %77  ;;  %664 = vperm.xlu2 %1701, %v618_v6  }
  0x87   :  { %1703 = vpow2.f32 %v130_v1  ;;  %v90_v4 = vmul.f32 %v1702_v55, %v78_v2  ;;  %868 = vperm.xlu1 %1700, %v834_v9   ;;  %v961_v55 = vld [vmem:[%s2693_s15 + $0x18] sm:$0xff]  ;;  %v960_v1 = vld [vmem:[%s2693_s15 + $0x10] sm:$0xff]  ;;  %v273_v2 = vpop.permute.xlu2 %272 }
  0x89   :  { %v2149_v5 = vpop.f32.mrf.mxu1  ;;  %v118_v7 = vadd.f32 %v109_v63, %v90_v4  ;;  %v99_v18 = vpop.permute.xlu1 %98 }
  0x8a   :  { %v116_v20 = vadd.f32 %v99_v18, %v88_v13  ;;  %v342_v3 = vadd.f32 %v2149_v5, %v258_v53 }
  0x8b   :  { %v122_v10 = vsub.f32 0.0, %v118_v7 }
  0x8c   :  { %659 = vperm.xlu0 %1699, %v617_v8   ;;  %v120_v24 = vsub.f32 0.0, %v116_v20 }
  0x8d   :  { %v1704_v12 = vpop.eup %1703  ;;  %v128_v14 = vmul.f32 1.442695, %v122_v10  ;;  %v146_v10 = vld [vmem:[%s2682_s4 + $0x10] sm:$0xff] }
  0x8e   :  { %v135_v16 = vadd.f32 1.0, %v1704_v12  ;;  %v104_v17 = vpop.permute.xlu0 %103  ;;  %v124_v28 = vmul.f32 1.442695, %v120_v24  ;;  %1061 = vperm.xlu2 %1701, %v956_v22   ;;  %v619_v12 = vld [vmem:[%s2691_s13 + $0x40] sm:$0xff] }
  0x8f   :  { %1705 = vpow2.f32 %v128_v14  ;;  %v117_v19 = vadd.f32 %v104_v17, %v89_v15  ;;  %1066 = vperm.xlu1 %1700, %v957_v26   ;;  %v959_v14 = vld [vmem:[%s2693_s15 + $0x8] sm:$0xff]  ;;  %v958_v15 = vld [vmem:[%s2693_s15] sm:$0xff] }
  0x90   :  { %1707 = vrcp.f32 %v135_v16 }
  0x91   :  { %v2160_v21 = vpop.f32.mrf.mxu1  ;;  %v121_v23 = vsub.f32 0.0, %v117_v19 }
  0x93   :  { %v126_v27 = vmul.f32 1.442695, %v121_v23 }
  0x94   :  { %873 = vperm.xlu0 %1699, %v835_v25  }
  0x95   :  { %v1706_v29 = vpop.eup %1705  ;;  %1709 = vpow2.f32 %v126_v27  ;;  %v1652_v27 = vld [vmem:[%s2689_s11 + $0x48] sm:$0xff] }
  0x96   :  { %v1708_v30 = vpop.eup %1707  ;;  %v134_v31 = vadd.f32 1.0, %v1706_v29  ;;  %1711 = vpow2.f32 %v124_v28  ;;  %1109 = vperm.xlu2 %1701, %v964_v34   ;;  %v263_v58 = vpop.permute.xlu0 %262 }
  0x97   :  { %v143_v32 = vmul.f32 %v1708_v30, %v119_v60  ;;  %1056 = vperm.xlu1 %1700, %v955_v36   ;;  %v268_v60 = vpop.permute.xlu1 %267  ;;  %v2213_v63 = vadd.f32 %v2160_v21, %v263_v58  ;;  %v620_v30 = vld [vmem:[%s2691_s13 + $0x48] sm:$0xff] }
  0x98   :  { %1713 = vrcp.f32 %v134_v31  ;;  %v1651_v31 = vld [vmem:[%s2689_s11 + $0x40] sm:$0xff] }
  0x99   :  { %v347_v33 = vpop.f32.mrf.mxu1  ;;  %197 = vmatpush.msra.mxu0 %v143_v32  ;;  %1684 = vmatpush.msra.mxu3 %v143_v32  ;;  %v381_v4 = vadd.f32 %v2213_v63, %v342_v3 }
  0x9a   :  { %v348_v6 = vadd.f32 %v347_v33, %v268_v60 }
  0x9b   :  { %v1710_v37 = vpop.eup %1709 }
  0x9c   :  { %v1712_v38 = vpop.eup %1711  ;;  %v133_v39 = vadd.f32 1.0, %v1710_v37  ;;  %1114 = vperm.xlu0 %1699, %v965_v35   ;;  %v382_v5 = vadd.f32 %v381_v4, %v348_v6  ;;  %v622_v37 = vld [vmem:[%s2691_s13 + $0x58] sm:$0xff] }
  0x9d   :  { %v132_v40 = vadd.f32 1.0, %v1712_v38 }
  0x9e   :  { %v1714_v41 = vpop.eup %1713  ;;  %1715 = vrcp.f32 %v133_v39  ;;  %1046 = vperm.xlu2 %1701, %v953_v44   ;;  %v278_v8 = vpop.permute.xlu0 %277  ;;  %v621_v39 = vld [vmem:[%s2691_s13 + $0x50] sm:$0xff] }
  0x9f   :  { %1717 = vrcp.f32 %v132_v40  ;;  %v142_v42 = vmul.f32 %v1714_v41, %v118_v7  ;;  %1104 = vperm.xlu1 %1700, %v963_v46   ;;  %v1870_v7 = vmov 64.0   ;;  %v283_v16 = vpop.permute.xlu1 %282  ;;  %v1653_v40 = vld [vmem:[%s2689_s11 + $0x50] sm:$0xff]  ;;  %v1655_v46 = vld [vmem:[%s2689_s11 + $0x60] sm:$0xff] }
  0xa0   :  { %1719 = vrcp.f32 %v1870_v7 }
  0xa1   :  { %v350_v43 = vpop.f32.mrf.mxu1  ;;  %198 = vmatpush.msra.mxu0 %v142_v42  ;;  %1685 = vmatpush.msra.mxu3 %v142_v42 }
  0xa2   :  { %v351_v9 = vadd.f32 %v350_v43, %v273_v2 }
  0xa4   :  { %v1716_v47 = vpop.eup %1715  ;;  %1051 = vperm.xlu0 %1699, %v954_v45   ;;  %v383_v18 = vadd.f32 %v382_v5, %v351_v9 }
  0xa5   :  { %v1718_v48 = vpop.eup %1717  ;;  %v141_v49 = vmul.f32 %v1716_v47, %v117_v19 }
  0xa6   :  { %v140_v50 = vmul.f32 %v1718_v48, %v116_v20  ;;  %1094 = vperm.xlu2 %1701, %v961_v55   ;;  %v1720_v17 = vpop.eup %1719  ;;  %v288_v20 = vpop.permute.xlu2 %287  ;;  %v1654_v48 = vld [vmem:[%s2689_s11 + $0x58] sm:$0xff] }
  0xa7   :  { %199 = vmatpush.msra.mxu0 %v141_v49  ;;  %1686 = vmatpush.msra.mxu3 %v141_v49  ;;  %v395_v23 = vmul.f32 64.0, %v1720_v17  ;;  %v293_v25 = vpop.permute.xlu0 %292  ;;  %vm399_vm3 = vweird.f32 %v1720_v17  ;;  %v623_v49 = vld [vmem:[%s2691_s13 + $0x60] sm:$0xff] }
  0xa8   :  { %1041 = vperm.xlu1 %1700, %v952_v57  }
  0xa9   :  { %v353_v54 = vpop.f32.mrf.mxu1  ;;  %200 = vmatpush.msra.mxu0 %v140_v50  ;;  %1687 = vmatpush.msra.mxu3 %v140_v50  ;;  %v396_v32 = vsub.f32 1.0, %v395_v23 }
  0xaa   :  { %1606 = vmatmul.msk.f32.vlgmr.msra.gmra.mxu0 %vm172_vm2, %v144_v51  ;;  %1609 = vmatmul.msk.f32.vlgmr.msra.gmra.mxu3 %vm172_vm2, %v147_v52  ;;  %v354_v13 = vadd.f32 %v353_v54, %v278_v8  ;;  %v1658_v8 = vld [vmem:[%s2689_s11 + $0x78] sm:$0xff] }
  0xab   :  { %v397_v35 = vmul.f32 %v1720_v17, %v396_v32  ;;  %v170_v32 = vpop.permute.xlu1 %169 }
  0xac   :  { %1099 = vperm.xlu0 %1699, %v962_v56   ;;  %v384_v21 = vadd.f32 %v383_v18, %v354_v13 }
  0xad   :  { %v398_v41 = vadd.f32 %v1720_v17, %v397_v35 }
  0xae   :  { %1031 = vperm.xlu2 %1701, %v950_v62   ;;  %v2355_v35 = vpop.permute.xlu2 %164 }
  0xaf   :  { %v2255_v44 = vsel %vm399_vm3, %v1720_v17, %v398_v41  ;;  %v1673_v17 = vld [vmem:[%s2692_s14 + $0x70] sm:$0xff] }
  0xb0   :  { %1089 = vperm.xlu1 %1700, %v960_v1  }
  0xb1   :  { %v356_v61 = vpop.f32.mrf.mxu1 }
  0xb2   :  { %1607 = vmatmul.msk.f32.gmra.mxu0 %vm172_vm2, %v145_v59  ;;  %v357_v19 = vadd.f32 %v356_v61, %v283_v16  ;;  %v625_v59 = vld [vmem:[%s2691_s13 + $0x70] sm:$0xff]  ;;  %v1674_v16 = vld [vmem:[%s2692_s14 + $0x78] sm:$0xff] }
  0xb3   :  { %v155_v41 = vpop.permute.xlu1 %154 }
  0xb4   :  { %1036 = vperm.xlu0 %1699, %v951_v0   ;;  %v385_v24 = vadd.f32 %v384_v21, %v357_v19  ;;  %v1656_v0 = vld [vmem:[%s2689_s11 + $0x68] sm:$0xff] }
  0xb5   :  { %v1672_v21 = vld [vmem:[%s2692_s14 + $0x68] sm:$0xff] }
  0xb6   :  { %669 = vperm.xlu2 %1701, %v619_v12   ;;  %v626_v12 = vld [vmem:[%s2691_s13 + $0x78] sm:$0xff] }
  0xb8   :  { %1079 = vperm.xlu1 %1700, %v958_v15   ;;  %v1682_v15 = vld [vmem:[%s2693_s15 + $0x78] sm:$0xff] }
  0xb9   :  { %v359_v11 = vpop.f32.mrf.mxu1 }
  0xba   :  { %1608 = vmatmul.msk.f32.gmra.mxu0 %vm172_vm2, %v146_v10  ;;  %v360_v22 = vadd.f32 %v359_v11, %v288_v20  ;;  %v1657_v11 = vld [vmem:[%s2689_s11 + $0x70] sm:$0xff]  ;;  %v1671_v20 = vld [vmem:[%s2692_s14 + $0x60] sm:$0xff] }
  0xbc   :  { %1084 = vperm.xlu0 %1699, %v959_v14   ;;  %v386_v28 = vadd.f32 %v385_v24, %v360_v22 }
  0xbe   :  { %1206 = vperm.xlu2 %1701, %v1652_v27   ;;  %v1670_v27 = vld [vmem:[%s2692_s14 + $0x58] sm:$0xff] }
  0xc0   :  { %1201 = vperm.xlu1 %1700, %v1651_v31   ;;  %v1669_v31 = vld [vmem:[%s2692_s14 + $0x50] sm:$0xff] }
  0xc1   :  { %v362_v26 = vpop.f32.mrf.mxu1 }
  0xc2   :  { %v363_v29 = vadd.f32 %v362_v26, %v293_v25  ;;  %v1679_v25 = vld [vmem:[%s2693_s15 + $0x60] sm:$0xff]  ;;  %v1680_v26 = vld [vmem:[%s2693_s15 + $0x68] sm:$0xff] }
  0xc4   :  { %v387_v33 = vadd.f32 %v386_v28, %v363_v29  ;;  %674 = vperm.xlu0 %1699, %v620_v30   ;;  %v1668_v30 = vld [vmem:[%s2692_s14 + $0x48] sm:$0xff] }
  0xc6   :  { %v388_v34 = vrot.slane %v387_v33, 4  ;;  %684 = vperm.xlu2 %1701, %v622_v37   ;;  %v1676_v37 = vld [vmem:[%s2693_s15 + $0x48] sm:$0xff] }
  0xc8   :  { %v389_v36 = vadd.f32 %v388_v34, %v387_v33  ;;  %1211 = vperm.xlu1 %1700, %v1653_v40   ;;  %v1678_v33 = vld [vmem:[%s2693_s15 + $0x58] sm:$0xff]  ;;  %v1667_v40 = vld [vmem:[%s2692_s14 + $0x40] sm:$0xff] }
  0xca   :  { %v390_v38 = vrot.slane %v389_v36, 2 }
  0xcc   :  { %v391_v42 = vadd.f32 %v390_v38, %v389_v36  ;;  %679 = vperm.xlu0 %1699, %v621_v39   ;;  %v1677_v38 = vld [vmem:[%s2693_s15 + $0x50] sm:$0xff]  ;;  %v160_v39 = vpop.permute.xlu0 %159 }
  0xce   :  { %v392_v43 = vrot.slane %v391_v42, 1  ;;  %1221 = vperm.xlu2 %1701, %v1655_v46   ;;  %v1546_v46 = vld [vmem:[%s2695_s17] sm:$0xff] }
  0xd0   :  { %v393_v45 = vadd.f32 %v392_v43, %v391_v42  ;;  %689 = vperm.xlu1 %1700, %v623_v49   ;;  %v489_v42 = vpop.permute.xlu2 %488  ;;  %v537_v49 = vpop.permute.xlu1 %536 }
  0xd2   :  { %v401_v47 = vmul.f32 %v2255_v44, %v393_v45  ;;  %v1675_v45 = vld [vmem:[%s2693_s15 + $0x40] sm:$0xff] }
  0xd4   :  { %v2267_v50 = vsub.f32 %v342_v3, %v401_v47  ;;  %v2270_v51 = vsub.f32 %v2213_v63, %v401_v47  ;;  %v2272_v52 = vsub.f32 %v348_v6, %v401_v47  ;;  %1216 = vperm.xlu0 %1699, %v1654_v48   ;;  %v2274_v53 = vsub.f32 %v351_v9, %v401_v47  ;;  %v624_v63 = vld [vmem:[%s2691_s13 + $0x68] sm:$0xff] }
  0xd5   :  { %v2280_v56 = vsub.f32 %v354_v13, %v401_v47  ;;  %v2287_v60 = vsub.f32 %v357_v19, %v401_v47  ;;  %v2299_v3 = vsub.f32 %v360_v22, %v401_v47  ;;  %v2306_v9 = vsub.f32 %v363_v29, %v401_v47  ;;  %v1681_v22 = vld [vmem:[%s2693_s15 + $0x70] sm:$0xff]  ;;  %v484_v47 = vpop.permute.xlu0 %483 }
  0xd6   :  { %v410_v54 = vmul.f32 %v2267_v50, %v2267_v50  ;;  %v411_v55 = vmul.f32 %v2270_v51, %v2270_v51  ;;  %v412_v57 = vmul.f32 %v2272_v52, %v2272_v52  ;;  %v413_v61 = vmul.f32 %v2274_v53, %v2274_v53  ;;  %699 = vperm.xlu2 %1701, %v625_v59  }
  0xd7   :  { %v414_v1 = vmul.f32 %v2280_v56, %v2280_v56  ;;  %v415_v4 = vmul.f32 %v2287_v60, %v2287_v60  ;;  %v416_v10 = vmul.f32 %v2299_v3, %v2299_v3  ;;  %v417_v13 = vmul.f32 %v2306_v9, %v2306_v9 }
  0xd8   :  { %v418_v58 = vadd.f32 %v411_v55, %v410_v54  ;;  %1226 = vperm.xlu1 %1700, %v1656_v0   ;;  %v479_v54 = vpop.permute.xlu2 %478  ;;  %v474_v59 = vpop.permute.xlu1 %473 }
  0xda   :  { %v419_v62 = vadd.f32 %v418_v58, %v412_v57 }
  0xdc   :  { %v420_v2 = vadd.f32 %v419_v62, %v413_v61  ;;  %694 = vperm.xlu0 %1699, %v624_v63  }
  0xdd   :  { %v532_v58 = vpop.permute.xlu0 %531 }
  0xde   :  { %v421_v6 = vadd.f32 %v420_v2, %v414_v1  ;;  %1236 = vperm.xlu2 %1701, %v1658_v8  }
  0xe0   :  { %v422_v7 = vadd.f32 %v421_v6, %v415_v4  ;;  %704 = vperm.xlu1 %1700, %v626_v12   ;;  %v527_v62 = vpop.permute.xlu2 %526  ;;  %v522_v4 = vpop.permute.xlu1 %521 }
  0xe2   :  { %v423_v5 = vadd.f32 %v422_v7, %v416_v10 }
  0xe4   :  { %1231 = vperm.xlu0 %1699, %v1657_v11   ;;  %v424_v14 = vadd.f32 %v423_v5, %v417_v13 }
  0xe5   :  { %v469_v2 = vpop.permute.xlu0 %468 }
  0xe6   :  { %v425_v18 = vrot.slane %v424_v14, 4  ;;  %1478 = vperm.xlu2 %1701, %v1682_v15  }
  0xe8   :  { %1425 = vperm.xlu1 %1700, %v1673_v17   ;;  %v426_v19 = vadd.f32 %v425_v18, %v424_v14  ;;  %v464_v7 = vpop.permute.xlu2 %463 }
  0xea   :  { %v427_v23 = vrot.slane %v426_v19, 2 }
  0xec   :  { %1430 = vperm.xlu0 %1699, %v1674_v16   ;;  %v428_v24 = vadd.f32 %v427_v23, %v426_v19 }
  0xed   :  { %v517_v19 = vpop.permute.xlu0 %516 }
  0xee   :  { %1415 = vperm.xlu2 %1701, %v1671_v20   ;;  %v429_v28 = vrot.slane %v428_v24, 1 }
  0xf0   :  { %1473 = vperm.xlu1 %1700, %v1681_v22   ;;  %v430_v29 = vadd.f32 %v429_v28, %v428_v24 }
  0xf2   :  { %v431_v34 = vmul.f32 %v430_v29, %v2255_v44 }
  0xf4   :  { %1420 = vperm.xlu0 %1699, %v1672_v21   ;;  %v432_v36 = vadd.f32 1e-05, %v431_v34 }
  0xf6   :  { %1463 = vperm.xlu2 %1701, %v1679_v25   ;;  %1721 = vrsqrt.f32 %v432_v36  ;;  %vm439_vm5 = vweird.f32 %v432_v36 }
  0xf8   :  { %1410 = vperm.xlu1 %1700, %v1670_v27  }
  0xfc   :  { %1468 = vperm.xlu0 %1699, %v1680_v26   ;;  %v1722_v43 = vpop.eup %1721 }
  0xfd   :  { %v434_v48 = vmul.f32 %v1722_v43, %v432_v36  ;;  %vm440_vm4 = vweird.f32 %v1722_v43 }
  0xfe   :  { %1400 = vperm.xlu2 %1701, %v1668_v30   ;;  %vm441_vm6 = vmor %vm439_vm5, %vm440_vm4 }
  0xff   :  { %v435_v55 = vmul.f32 %v1722_v43, %v434_v48 }
 0x100   :  { %1458 = vperm.xlu1 %1700, %v1678_v33  }
 0x101   :  { %v436_v57 = vmul.f32 0.5, %v435_v55 }
 0x103   :  { %v437_v61 = vsub.f32 1.5, %v436_v57 }
 0x104   :  { %1405 = vperm.xlu0 %1699, %v1669_v31  }
 0x105   :  { %v438_v63 = vmul.f32 %v1722_v43, %v437_v61 }
 0x106   :  { %1448 = vperm.xlu2 %1701, %v1676_v37  }
 0x107   :  { %v442_v1 = vsel %vm441_vm6, %v1722_v43, %v438_v63 }
 0x108   :  { %1395 = vperm.xlu1 %1700, %v1667_v40   ;;  %v450_v6 = vmul.f32 %v442_v1, %v2306_v9  ;;  %v449_v10 = vmul.f32 %v442_v1, %v2299_v3  ;;  %v448_v13 = vmul.f32 %v442_v1, %v2287_v60  ;;  %v447_v14 = vmul.f32 %v442_v1, %v2280_v56  ;;  %v459_v60 = vpop.permute.xlu1 %458 }
 0x109   :  { %v446_v9 = vmul.f32 %v442_v1, %v2274_v53  ;;  %v445_v24 = vmul.f32 %v442_v1, %v2272_v52  ;;  %v512_v53 = vpop.permute.xlu2 %511  ;;  %v444_v29 = vmul.f32 %v442_v1, %v2270_v51  ;;  %v443_v37 = vmul.f32 %v442_v1, %v2267_v50 }
 0x10a   :  { %v498_v12 = vmul.f32 %v489_v42, %v450_v6  ;;  %v497_v18 = vmul.f32 %v484_v47, %v449_v10  ;;  %v496_v22 = vmul.f32 %v479_v54, %v448_v13  ;;  %v495_v23 = vmul.f32 %v474_v59, %v447_v14 }
 0x10b   :  { %v494_v25 = vmul.f32 %v469_v2, %v446_v9  ;;  %v493_v36 = vmul.f32 %v464_v7, %v445_v24 }
 0x10c   :  { %1453 = vperm.xlu0 %1699, %v1677_v38   ;;  %v2385_v21 = vadd.f32 %v537_v49, %v498_v12  ;;  %v2389_v27 = vadd.f32 %v532_v58, %v497_v18  ;;  %v2393_v31 = vadd.f32 %v527_v62, %v496_v22 }
 0x10d   :  { %v2400_v52 = vadd.f32 %v517_v19, %v494_v25  ;;  %v2407_v47 = vadd.f32 %v512_v53, %v493_v36 }
 0x10e   :  { %v554_v28 = vsub.f32 0.0, %v2385_v21  ;;  %v553_v38 = vsub.f32 0.0, %v2389_v27  ;;  %v552_v43 = vsub.f32 0.0, %v2393_v31 }
 0x10f   :  { %v550_v50 = vsub.f32 0.0, %v2400_v52  ;;  %v549_v62 = vsub.f32 0.0, %v2407_v47 }
 0x110   :  { %1549 = vperm.xlu1 %1700, %v1546_v46   ;;  %v569_v40 = vmul.f32 1.442695, %v554_v28  ;;  %v567_v49 = vmul.f32 1.442695, %v553_v38  ;;  %v507_v54 = vpop.permute.xlu1 %506  ;;  %v565_v58 = vmul.f32 1.442695, %v552_v43 }
 0x111   :  { %v502_v59 = vpop.permute.xlu2 %501  ;;  %v561_v63 = vmul.f32 1.442695, %v550_v50  ;;  %v559_v10 = vmul.f32 1.442695, %v549_v62  ;;  %v601_v62 = vld [vmem:[%s2690_s12 + $0x30] sm:$0xff] }
 0x114   :  { %1443 = vperm.xlu0 %1699, %v1675_v45  }
 0x127   :  { %v202_v0 = vpop.f32.mrf.mxu0 }
 0x128   :  { %v2378_v15 = vadd.f32 %v202_v0, %v155_v41  ;;  %v492_v41 = vmul.f32 %v459_v60, %v444_v29 }
 0x12a   :  { %v214_v56 = vsub.f32 0.0, %v2378_v15  ;;  %v2410_v57 = vadd.f32 %v507_v54, %v492_v41 }
 0x12c   :  { %v218_v33 = vmul.f32 1.442695, %v214_v56  ;;  %v548_v6 = vsub.f32 0.0, %v2410_v57 }
 0x12d   :  { %v211_v8 = vpop.f32.mrf.mxu3 }
 0x12e   :  { %v2374_v11 = vadd.f32 %v211_v8, %v170_v32  ;;  %v2395_v32 = vadd.f32 %v522_v4, %v495_v23  ;;  %v557_v9 = vmul.f32 1.442695, %v548_v6  ;;  %v604_v6 = vld [vmem:[%s2690_s12 + $0x48] sm:$0xff] }
 0x12f   :  { %v205_v5 = vpop.f32.mrf.mxu0 }
 0x130   :  { %v217_v16 = vsub.f32 0.0, %v2374_v11  ;;  %v2381_v17 = vadd.f32 %v205_v5, %v160_v39  ;;  %v551_v45 = vsub.f32 0.0, %v2395_v32 }
 0x132   :  { %v224_v20 = vmul.f32 1.442695, %v217_v16  ;;  %v215_v3 = vsub.f32 0.0, %v2381_v17  ;;  %v563_v61 = vmul.f32 1.442695, %v551_v45 }
 0x134   :  { %1723 = vpow2.f32 %v224_v20  ;;  %v220_v26 = vmul.f32 1.442695, %v215_v3 }
 0x136   :  { %1725 = vpow2.f32 %v220_v26 }
 0x137   :  { %v208_v30 = vpop.f32.mrf.mxu0  ;;  %1727 = vpow2.f32 %v218_v33 }
 0x138   :  { %v2398_v34 = vadd.f32 %v208_v30, %v2355_v35  ;;  %v454_v35 = vpop.permute.xlu0 %453 }
 0x139   :  { %v491_v48 = vmul.f32 %v454_v35, %v443_v37 }
 0x13a   :  { %v1724_v39 = vpop.eup %1723  ;;  %v216_v51 = vsub.f32 0.0, %v2398_v34 }
 0x13b   :  { %v229_v42 = vadd.f32 1.0, %v1724_v39  ;;  %v2413_v0 = vadd.f32 %v502_v59, %v491_v48  ;;  %v609_v39 = vld [vmem:[%s2690_s12 + $0x70] sm:$0xff]  ;;  %v599_v59 = vld [vmem:[%s2690_s12 + $0x20] sm:$0xff] }
 0x13c   :  { %v222_v46 = vmul.f32 1.442695, %v216_v51  ;;  %v1726_v55 = vpop.eup %1725 }
 0x13d   :  { %1729 = vrcp.f32 %v229_v42  ;;  %v1728_v1 = vpop.eup %1727  ;;  %v227_v2 = vadd.f32 1.0, %v1726_v55  ;;  %v547_v5 = vsub.f32 0.0, %v2413_v0 }
 0x13e   :  { %1731 = vpow2.f32 %v222_v46  ;;  %v226_v13 = vadd.f32 1.0, %v1728_v1  ;;  %v596_v46 = vld [vmem:[%s2690_s12 + $0x8] sm:$0xff]  ;;  %v823_v1 = vld [vmem:[%s2688_s10 + $0x18] sm:$0xff] }
 0x13f   :  { %1733 = vpow2.f32 %v569_v40  ;;  %v555_v20 = vmul.f32 1.442695, %v547_v5  ;;  %v827_v5 = vld [vmem:[%s2688_s10 + $0x38] sm:$0xff] }
 0x140   :  { %1735 = vpow2.f32 %v567_v49 }
 0x141   :  { %1737 = vpow2.f32 %v565_v58 }
 0x142   :  { %1739 = vpow2.f32 %v563_v61  ;;  %v821_v61 = vld [vmem:[%s2688_s10 + $0x8] sm:$0xff] }
 0x143   :  { %v1730_v4 = vpop.eup %1729  ;;  %1741 = vpow2.f32 %v561_v63  ;;  %v822_v63 = vld [vmem:[%s2688_s10 + $0x10] sm:$0xff] }
 0x144   :  { %v1732_v7 = vpop.eup %1731  ;;  %v237_v8 = vmul.f32 %v1730_v4, %v2374_v11  ;;  %1743 = vrcp.f32 %v227_v2  ;;  %v603_v2 = vld [vmem:[%s2690_s12 + $0x40] sm:$0xff] }
 0x145   :  { %v1734_v12 = vpop.eup %1733  ;;  %v228_v14 = vadd.f32 1.0, %v1732_v7  ;;  %v824_v4 = vld [vmem:[%s2688_s10 + $0x20] sm:$0xff]  ;;  %v825_v7 = vld [vmem:[%s2688_s10 + $0x28] sm:$0xff] }
 0x146   :  { %767 = vmatpush.msrb.mxu1 %v237_v8  ;;  %1688 = vmatpush.msra.mxu2 %v237_v8  ;;  %v1736_v16 = vpop.eup %1735  ;;  %v578_v18 = vadd.f32 1.0, %v1734_v12  ;;  %v606_v12 = vld [vmem:[%s2690_s12 + $0x58] sm:$0xff] }
 0x147   :  { %1745 = vrcp.f32 %v228_v14  ;;  %1689 = vmatpush.msrb.mxu3 %v237_v8  ;;  %v1738_v19 = vpop.eup %1737  ;;  %v577_v3 = vadd.f32 1.0, %v1736_v16  ;;  %v605_v8 = vld [vmem:[%s2690_s12 + $0x50] sm:$0xff]  ;;  %v608_v14 = vld [vmem:[%s2690_s12 + $0x68] sm:$0xff] }
 0x148   :  { %1747 = vpow2.f32 %v559_v10  ;;  %v1740_v11 = vpop.eup %1739  ;;  %v576_v60 = vadd.f32 1.0, %v1738_v19  ;;  %v826_v10 = vld [vmem:[%s2688_s10 + $0x30] sm:$0xff] }
 0x149   :  { %1749 = vrcp.f32 %v226_v13  ;;  %v1742_v22 = vpop.eup %1741  ;;  %v575_v25 = vadd.f32 1.0, %v1740_v11  ;;  %v607_v13 = vld [vmem:[%s2690_s12 + $0x60] sm:$0xff] }
 0x14a   :  { %1751 = vpow2.f32 %v557_v9  ;;  %v1744_v23 = vpop.eup %1743  ;;  %v574_v28 = vadd.f32 1.0, %v1742_v22 }
 0x14b   :  { %1753 = vrcp.f32 %v578_v18  ;;  %v235_v29 = vmul.f32 %v1744_v23, %v2381_v17  ;;  %v597_v17 = vld [vmem:[%s2690_s12 + $0x10] sm:$0xff]  ;;  %v839_v23 = vpop.permute.xlu2 %838 }
 0x14c   :  { %1755 = vpow2.f32 %v555_v20  ;;  %v630_v20 = vpop.permute.xlu0 %629 }
 0x14d   :  { %v1746_v56 = vpop.eup %1745  ;;  %1757 = vrcp.f32 %v577_v3  ;;  %v635_v3 = vpop.permute.xlu1 %634 }
 0x14e   :  { %v1748_v24 = vpop.eup %1747  ;;  %v236_v26 = vmul.f32 %v1746_v56, %v2398_v34  ;;  %1759 = vrcp.f32 %v576_v60  ;;  %v595_v34 = vld [vmem:[%s2690_s12] sm:$0xff] }
 0x14f   :  { %v1750_v53 = vpop.eup %1749  ;;  %1761 = vrcp.f32 %v575_v25  ;;  %v573_v37 = vadd.f32 1.0, %v1748_v24 }
 0x150   :  { %768 = vmatpush.msrb.mxu1 %v236_v26  ;;  %1690 = vmatpush.msra.mxu2 %v236_v26  ;;  %v1752_v30 = vpop.eup %1751  ;;  %v234_v36 = vmul.f32 %v1750_v53, %v2378_v15  ;;  %1763 = vrcp.f32 %v574_v28 }
 0x151   :  { %1691 = vmatpush.msrb.mxu3 %v236_v26  ;;  %v1754_v33 = vpop.eup %1753  ;;  %v572_v15 = vadd.f32 1.0, %v1752_v30  ;;  %1765 = vrcp.f32 %v573_v37 }
 0x152   :  { %769 = vmatpush.msrb.mxu1 %v235_v29  ;;  %1692 = vmatpush.msra.mxu2 %v235_v29  ;;  %v1756_v38 = vpop.eup %1755  ;;  %v2432_v40 = vmul.f32 %v1754_v33, %v2385_v21 }
 0x153   :  { %1693 = vmatpush.msrb.mxu3 %v235_v29  ;;  %v1758_v51 = vpop.eup %1757  ;;  %v571_v42 = vadd.f32 1.0, %v1756_v38  ;;  %1767 = vrcp.f32 %v572_v15  ;;  %v849_v53 = vpop.permute.xlu2 %848 }
 0x154   :  { %770 = vmatpush.msrb.mxu1 %v234_v36  ;;  %1694 = vmatpush.msra.mxu2 %v234_v36  ;;  %v1760_v41 = vpop.eup %1759  ;;  %v2438_v43 = vmul.f32 %v1758_v51, %v2389_v27  ;;  %v598_v27 = vld [vmem:[%s2690_s12 + $0x18] sm:$0xff]  ;;  %v844_v60 = vpop.permute.xlu0 %843 }
 0x155   :  { %1695 = vmatpush.msrb.mxu3 %v234_v36  ;;  %1619 = vmatmul.msk.f32.vlgmr.msrb.gmra.mxu1 %vm172_vm2, %v595_v34  ;;  %v1762_v45 = vpop.eup %1761  ;;  %v2442_v35 = vmul.f32 %v1760_v41, %v2393_v31  ;;  %1769 = vrcp.f32 %v571_v42  ;;  %v610_v31 = vld [vmem:[%s2690_s12 + $0x78] sm:$0xff]  ;;  %v640_v24 = vpop.permute.xlu1 %639 }
 0x156   :  { %1621 = vmatmul.msk.f32.vlgmr.msra.gmra.mxu2 %vm172_vm2, %v597_v17  ;;  %1633 = vmatmul.msk.f32.vlgmr.msrb.gmra.mxu3 %vm172_vm2, %v609_v39  ;;  %v1764_v21 = vpop.eup %1763  ;;  %v2448_v50 = vmul.f32 %v1762_v45, %v2395_v32 }
 0x157   :  { %909 = vmatpush.msra.mxu3 %v2432_v40  ;;  %v1766_v48 = vpop.eup %1765  ;;  %v2458_v49 = vmul.f32 %v1764_v21, %v2400_v52 }
 0x158   :  { %v2466_v54 = vmul.f32 %v1766_v48, %v2407_v47  ;;  %v820_v47 = vld [vmem:[%s2688_s10] sm:$0xff] }
 0x159   :  { %910 = vmatpush.msra.mxu3 %v2438_v43  ;;  %v1768_v32 = vpop.eup %1767 }
 0x15a   :  { %v2469_v58 = vmul.f32 %v1768_v32, %v2410_v57  ;;  %v600_v57 = vld [vmem:[%s2690_s12 + $0x28] sm:$0xff] }
 0x15b   :  { %911 = vmatpush.msra.mxu3 %v2442_v35  ;;  %v1770_v55 = vpop.eup %1769  ;;  %v650_v34 = vpop.permute.xlu2 %649 }
 0x15c   :  { %v2474_v52 = vmul.f32 %v1770_v55, %v2413_v0  ;;  %v602_v0 = vld [vmem:[%s2690_s12 + $0x38] sm:$0xff]  ;;  %v645_v28 = vpop.permute.xlu0 %644 }
 0x15d   :  { %912 = vmatpush.msra.mxu3 %v2448_v50  ;;  %1620 = vmatmul.msk.f32.gmra.mxu1 %vm172_vm2, %v596_v46  ;;  %v854_v29 = vpop.permute.xlu1 %853 }
 0x15e   :  { %1622 = vmatmul.msk.f32.gmra.mxu2 %vm172_vm2, %v598_v27  ;;  %1634 = vmatmul.msk.f32.gmra.mxu3 %vm172_vm2, %v610_v31 }
 0x15f   :  { %913 = vmatpush.msra.mxu3 %v2458_v49 }
 0x161   :  { %914 = vmatpush.msra.mxu3 %v2466_v54 }
 0x163   :  { %915 = vmatpush.msra.mxu3 %v2469_v58  ;;  %v864_v21 = vpop.permute.xlu2 %863 }
 0x164   :  { %v859_v37 = vpop.permute.xlu0 %858 }
 0x165   :  { %916 = vmatpush.msra.mxu3 %v2474_v52  ;;  %v655_v38 = vpop.permute.xlu1 %654 }
 0x166   :  { %1623 = vmatmul.msk.f32.gmra.mxu2 %vm172_vm2, %v599_v59  ;;  %1635 = vmatmul.msk.f32.vlgmr.msra.gmra.mxu3 %vm876_vm7, %v820_v47 }
 0x16c   :  { %v660_v32 = vpop.permute.xlu0 %659 }
 0x16e   :  { %1624 = vmatmul.msk.f32.gmra.mxu2 %vm172_vm2, %v600_v57  ;;  %1636 = vmatmul.msk.f32.gmra.mxu3 %vm876_vm7, %v821_v61 }
 0x176   :  { %1625 = vmatmul.msk.f32.gmra.mxu2 %vm172_vm2, %v601_v62  ;;  %1637 = vmatmul.msk.f32.gmra.mxu3 %vm876_vm7, %v822_v63 }
 0x17e   :  { %1626 = vmatmul.msk.f32.gmra.mxu2 %vm172_vm2, %v602_v0  ;;  %1638 = vmatmul.msk.f32.gmra.mxu3 %vm876_vm7, %v823_v1 }
 0x186   :  { %1627 = vmatmul.msk.f32.gmra.mxu2 %vm172_vm2, %v603_v2  ;;  %1639 = vmatmul.msk.f32.gmra.mxu3 %vm876_vm7, %v824_v4  ;;  %v869_v2 = vpop.permute.xlu1 %868 }
 0x18e   :  { %1628 = vmatmul.msk.f32.gmra.mxu2 %vm172_vm2, %v604_v6  ;;  %1640 = vmatmul.msk.f32.gmra.mxu3 %vm876_vm7, %v825_v7 }
 0x196   :  { %1629 = vmatmul.msk.f32.gmra.mxu2 %vm172_vm2, %v605_v8  ;;  %1641 = vmatmul.msk.f32.gmra.mxu3 %vm876_vm7, %v826_v10 }
 0x19e   :  { %1630 = vmatmul.msk.f32.gmra.mxu2 %vm172_vm2, %v606_v12  ;;  %1642 = vmatmul.msk.f32.gmra.mxu3 %vm876_vm7, %v827_v5 }
 0x1a6   :  { %1631 = vmatmul.msk.f32.gmra.mxu2 %vm172_vm2, %v607_v13 }
 0x1ae   :  { %1632 = vmatmul.msk.f32.gmra.mxu2 %vm172_vm2, %v608_v14  ;;  %v665_v14 = vpop.permute.xlu2 %664 }
 0x1d2   :  { %v772_v30 = vpop.f32.mrf.mxu1 }
 0x1d3   :  { %v773_v46 = vadd.f32 %v772_v30, %v630_v20  ;;  %v874_v20 = vpop.permute.xlu0 %873 }
 0x1d9   :  { %v2549_v16 = vpop.f32.mrf.mxu3  ;;  %v778_v19 = vpop.f32.mrf.mxu2 }
 0x1da   :  { %v775_v17 = vpop.f32.mrf.mxu1  ;;  %v779_v27 = vadd.f32 %v778_v19, %v640_v24 }
 0x1db   :  { %v776_v15 = vadd.f32 %v775_v17, %v635_v3 }
 0x1e1   :  { %v2551_v9 = vpop.f32.mrf.mxu3  ;;  %v781_v22 = vpop.f32.mrf.mxu2 }
 0x1e2   :  { %v782_v55 = vadd.f32 %v781_v22, %v645_v28 }
 0x1e9   :  { %v918_v18 = vpop.f32.mrf.mxu3  ;;  %v784_v25 = vpop.f32.mrf.mxu2 }
 0x1ea   :  { %v919_v41 = vadd.f32 %v918_v18, %v839_v23  ;;  %v785_v62 = vadd.f32 %v784_v25, %v650_v34 }
 0x1ec   :  { %v942_v59 = vadd.f32 %v919_v41, %v773_v46 }
 0x1f1   :  { %v921_v11 = vpop.f32.mrf.mxu3  ;;  %v787_v36 = vpop.f32.mrf.mxu2 }
 0x1f2   :  { %v922_v51 = vadd.f32 %v921_v11, %v844_v60  ;;  %v788_v4 = vadd.f32 %v787_v36, %v655_v38 }
 0x1f4   :  { %v943_v31 = vadd.f32 %v922_v51, %v776_v15 }
 0x1f6   :  { %v966_v63 = vadd.f32 %v943_v31, %v942_v59 }
 0x1f9   :  { %v924_v56 = vpop.f32.mrf.mxu3  ;;  %v790_v45 = vpop.f32.mrf.mxu2 }
 0x1fa   :  { %v925_v42 = vadd.f32 %v924_v56, %v849_v53  ;;  %v791_v10 = vadd.f32 %v790_v45, %v660_v32 }
 0x1fc   :  { %v944_v47 = vadd.f32 %v925_v42, %v779_v27  ;;  %v1067_v42 = vpop.permute.xlu1 %1066 }
 0x1fe   :  { %v967_v6 = vadd.f32 %v966_v63, %v944_v47 }
 0x201   :  { %v927_v26 = vpop.f32.mrf.mxu3  ;;  %v793_v13 = vpop.f32.mrf.mxu2 }
 0x202   :  { %v928_v48 = vadd.f32 %v927_v26, %v854_v29  ;;  %v794_v3 = vadd.f32 %v793_v13, %v665_v14 }
 0x204   :  { %v945_v0 = vadd.f32 %v928_v48, %v782_v55 }
 0x206   :  { %v968_v12 = vadd.f32 %v967_v6, %v945_v0 }
 0x209   :  { %v930_v33 = vpop.f32.mrf.mxu3 }
 0x20a   :  { %v931_v57 = vadd.f32 %v930_v33, %v859_v37 }
 0x20c   :  { %v946_v7 = vadd.f32 %v931_v57, %v785_v62 }
 0x20e   :  { %v969_v18 = vadd.f32 %v968_v12, %v946_v7 }
 0x211   :  { %v933_v39 = vpop.f32.mrf.mxu3 }
 0x212   :  { %v934_v1 = vadd.f32 %v933_v39, %v864_v21 }
 0x214   :  { %v947_v5 = vadd.f32 %v934_v1, %v788_v4  ;;  %v1057_v1 = vpop.permute.xlu1 %1056 }
 0x216   :  { %v970_v22 = vadd.f32 %v969_v18, %v947_v5 }
 0x219   :  { %v936_v61 = vpop.f32.mrf.mxu3 }
 0x21a   :  { %v937_v8 = vadd.f32 %v936_v61, %v869_v2 }
 0x21c   :  { %v948_v19 = vadd.f32 %v937_v8, %v791_v10 }
 0x21e   :  { %v971_v60 = vadd.f32 %v970_v22, %v948_v19 }
 0x221   :  { %v939_v11 = vpop.f32.mrf.mxu3 }
 0x222   :  { %v940_v23 = vadd.f32 %v939_v11, %v874_v20 }
 0x224   :  { %v949_v56 = vadd.f32 %v940_v23, %v794_v3 }
 0x226   :  { %v972_v24 = vadd.f32 %v971_v60, %v949_v56 }
 0x228   :  { %v973_v25 = vrot.slane %v972_v24, 4 }
 0x22a   :  { %v974_v26 = vadd.f32 %v973_v25, %v972_v24 }
 0x22c   :  { %v975_v53 = vrot.slane %v974_v26, 2 }
 0x22e   :  { %v976_v28 = vadd.f32 %v975_v53, %v974_v26 }
 0x230   :  { %v977_v29 = vrot.slane %v976_v28, 1 }
 0x232   :  { %v978_v30 = vadd.f32 %v977_v29, %v976_v28 }
 0x234   :  { %v979_v33 = vmul.f32 %v978_v30, %v2255_v44 }
 0x236   :  { %v980_v36 = vsub.f32 %v942_v59, %v979_v33  ;;  %v981_v34 = vsub.f32 %v943_v31, %v979_v33  ;;  %v982_v37 = vsub.f32 %v944_v47, %v979_v33  ;;  %v983_v38 = vsub.f32 %v945_v0, %v979_v33  ;;  %v1062_v31 = vpop.permute.xlu2 %1061  ;;  %v1115_v0 = vpop.permute.xlu0 %1114 }
 0x237   :  { %v984_v51 = vsub.f32 %v946_v7, %v979_v33  ;;  %v985_v45 = vsub.f32 %v947_v5, %v979_v33  ;;  %v986_v27 = vsub.f32 %v948_v19, %v979_v33  ;;  %v987_v55 = vsub.f32 %v949_v56, %v979_v33  ;;  %v1105_v5 = vpop.permute.xlu1 %1104 }
 0x238   :  { %v988_v17 = vmul.f32 %v980_v36, %v980_v36  ;;  %v989_v39 = vmul.f32 %v981_v34, %v981_v34  ;;  %v990_v15 = vmul.f32 %v982_v37, %v982_v37  ;;  %v991_v21 = vmul.f32 %v983_v38, %v983_v38 }
 0x239   :  { %v992_v48 = vmul.f32 %v984_v51, %v984_v51  ;;  %v993_v57 = vmul.f32 %v985_v45, %v985_v45  ;;  %v994_v62 = vmul.f32 %v986_v27, %v986_v27  ;;  %v995_v47 = vmul.f32 %v987_v55, %v987_v55 }
 0x23a   :  { %v996_v41 = vadd.f32 %v989_v39, %v988_v17 }
 0x23c   :  { %v997_v46 = vadd.f32 %v996_v41, %v990_v15 }
 0x23e   :  { %v998_v32 = vadd.f32 %v997_v46, %v991_v21  ;;  %v1110_v8 = vpop.permute.xlu2 %1109  ;;  %v1052_v12 = vpop.permute.xlu0 %1051 }
 0x23f   :  { %v1042_v3 = vpop.permute.xlu1 %1041 }
 0x240   :  { %v999_v61 = vadd.f32 %v998_v32, %v992_v48 }
 0x242   :  { %v1000_v59 = vadd.f32 %v999_v61, %v993_v57 }
 0x244   :  { %v1001_v63 = vadd.f32 %v1000_v59, %v994_v62 }
 0x246   :  { %v1002_v2 = vadd.f32 %v1001_v63, %v995_v47  ;;  %v1047_v20 = vpop.permute.xlu2 %1046  ;;  %v1100_v11 = vpop.permute.xlu0 %1099 }
 0x247   :  { %v1090_v26 = vpop.permute.xlu1 %1089 }
 0x248   :  { %v1003_v4 = vrot.slane %v1002_v2, 4 }
 0x24a   :  { %v1004_v6 = vadd.f32 %v1003_v4, %v1002_v2 }
 0x24c   :  { %v1005_v7 = vrot.slane %v1004_v6, 2 }
 0x24e   :  { %v1006_v10 = vadd.f32 %v1005_v7, %v1004_v6  ;;  %v1095_v56 = vpop.permute.xlu2 %1094  ;;  %v1037_v25 = vpop.permute.xlu0 %1036 }
 0x24f   :  { %v1080_v6 = vpop.permute.xlu1 %1079 }
 0x250   :  { %v1007_v13 = vrot.slane %v1006_v10, 1 }
 0x252   :  { %v1008_v14 = vadd.f32 %v1007_v13, %v1006_v10 }
 0x254   :  { %v1009_v18 = vmul.f32 %v1008_v14, %v2255_v44 }
 0x256   :  { %v1010_v19 = vadd.f32 1e-05, %v1009_v18  ;;  %v1032_v48 = vpop.permute.xlu2 %1031  ;;  %v1085_v4 = vpop.permute.xlu0 %1084 }
 0x258   :  { %1771 = vrsqrt.f32 %v1010_v19  ;;  %vm1017_vm9 = vweird.f32 %v1010_v19 }
 0x25e   :  { %v1772_v22 = vpop.eup %1771 }
 0x25f   :  { %v1012_v23 = vmul.f32 %v1772_v22, %v1010_v19  ;;  %vm1018_vm8 = vweird.f32 %v1772_v22 }
 0x260   :  { %vm1019_vm10 = vmor %vm1017_vm9, %vm1018_vm8 }
 0x261   :  { %v1013_v60 = vmul.f32 %v1772_v22, %v1012_v23 }
 0x263   :  { %v1014_v24 = vmul.f32 0.5, %v1013_v60 }
 0x265   :  { %v1015_v53 = vsub.f32 1.5, %v1014_v24 }
 0x267   :  { %v1016_v28 = vmul.f32 %v1772_v22, %v1015_v53 }
 0x269   :  { %v1020_v29 = vsel %vm1019_vm10, %v1772_v22, %v1016_v28 }
 0x26a   :  { %v1028_v30 = vmul.f32 %v1020_v29, %v987_v55  ;;  %v1027_v33 = vmul.f32 %v1020_v29, %v986_v27  ;;  %v1026_v17 = vmul.f32 %v1020_v29, %v985_v45  ;;  %v1025_v39 = vmul.f32 %v1020_v29, %v984_v51 }
 0x26b   :  { %v1024_v15 = vmul.f32 %v1020_v29, %v983_v38  ;;  %v1023_v41 = vmul.f32 %v1020_v29, %v982_v37  ;;  %v1022_v21 = vmul.f32 %v1020_v29, %v981_v34  ;;  %v1021_v46 = vmul.f32 %v1020_v29, %v980_v36 }
 0x26c   :  { %v1076_v32 = vmul.f32 %v1067_v42, %v1028_v30  ;;  %v1075_v57 = vmul.f32 %v1062_v31, %v1027_v33  ;;  %v1074_v61 = vmul.f32 %v1057_v1, %v1026_v17  ;;  %v1073_v62 = vmul.f32 %v1052_v12, %v1025_v39 }
 0x26d   :  { %v1072_v59 = vmul.f32 %v1047_v20, %v1024_v15  ;;  %v1071_v47 = vmul.f32 %v1042_v3, %v1023_v41  ;;  %v1070_v63 = vmul.f32 %v1037_v25, %v1022_v21  ;;  %v1069_v2 = vmul.f32 %v1032_v48, %v1021_v46 }
 0x26e   :  { %v1124_v7 = vadd.f32 %v1115_v0, %v1076_v32  ;;  %v1123_v55 = vadd.f32 %v1110_v8, %v1075_v57  ;;  %v1122_v27 = vadd.f32 %v1105_v5, %v1074_v61  ;;  %v2555_v45 = vadd.f32 %v1100_v11, %v1073_v62 }
 0x26f   :  { %v2557_v38 = vadd.f32 %v1095_v56, %v1072_v59  ;;  %v2559_v34 = vadd.f32 %v1090_v26, %v1071_v47  ;;  %v2561_v36 = vadd.f32 %v1085_v4, %v1070_v63  ;;  %v2563_v37 = vadd.f32 %v1080_v6, %v1069_v2 }
 0x270   :  { %v1132_v51 = vsub.f32 0.0, %v1124_v7  ;;  %v1131_v42 = vsub.f32 0.0, %v1123_v55  ;;  %v1130_v31 = vsub.f32 0.0, %v1122_v27  ;;  %v1129_v1 = vsub.f32 0.0, %v2555_v45 }
 0x271   :  { %v1128_v10 = vsub.f32 0.0, %v2557_v38  ;;  %v1127_v0 = vsub.f32 0.0, %v2559_v34  ;;  %v1126_v8 = vsub.f32 0.0, %v2561_v36  ;;  %v1125_v18 = vsub.f32 0.0, %v2563_v37 }
 0x272   :  { %v1147_v12 = vmul.f32 1.442695, %v1132_v51  ;;  %v1145_v5 = vmul.f32 1.442695, %v1131_v42  ;;  %v1143_v13 = vmul.f32 1.442695, %v1130_v31 }
 0x273   :  { %v1141_v14 = vmul.f32 1.442695, %v1129_v1  ;;  %v1139_v19 = vmul.f32 1.442695, %v1128_v10  ;;  %v1137_v20 = vmul.f32 1.442695, %v1127_v0  ;;  %v796_v1 = vpop.f32.mrf.mxu2  ;;  %v670_v0 = vpop.permute.xlu2 %669 }
 0x274   :  { %1773 = vpow2.f32 %v1147_v12  ;;  %v1135_v11 = vmul.f32 1.442695, %v1126_v8  ;;  %v1133_v3 = vmul.f32 1.442695, %v1125_v18  ;;  %v1649_v42 = vld [vmem:[%s2688_s10 + $0x70] sm:$0xff]  ;;  %v1650_v31 = vld [vmem:[%s2688_s10 + $0x78] sm:$0xff] }
 0x275   :  { %1775 = vpow2.f32 %v1145_v5  ;;  %v675_v5 = vpop.permute.xlu0 %674 }
 0x276   :  { %1777 = vpow2.f32 %v1143_v13 }
 0x277   :  { %1779 = vpow2.f32 %v1141_v14  ;;  %v1202_v14 = vpop.permute.xlu1 %1201 }
 0x278   :  { %1781 = vpow2.f32 %v1139_v19 }
 0x279   :  { %1783 = vpow2.f32 %v1137_v20 }
 0x27a   :  { %v1774_v22 = vpop.eup %1773  ;;  %1785 = vpow2.f32 %v1135_v11 }
 0x27b   :  { %v1776_v23 = vpop.eup %1775  ;;  %v1156_v60 = vadd.f32 1.0, %v1774_v22  ;;  %1787 = vpow2.f32 %v1133_v3  ;;  %v799_v8 = vpop.f32.mrf.mxu2 }
 0x27c   :  { %v1778_v56 = vpop.eup %1777  ;;  %v1155_v24 = vadd.f32 1.0, %v1776_v23  ;;  %v1207_v13 = vpop.permute.xlu2 %1206 }
 0x27d   :  { %v1780_v25 = vpop.eup %1779  ;;  %1789 = vrcp.f32 %v1156_v60  ;;  %v1154_v26 = vadd.f32 1.0, %v1778_v56  ;;  %v680_v20 = vpop.permute.xlu0 %679 }
 0x27e   :  { %v1782_v53 = vpop.eup %1781  ;;  %1791 = vrcp.f32 %v1155_v24  ;;  %v1153_v28 = vadd.f32 1.0, %v1780_v25 }
 0x27f   :  { %v1784_v29 = vpop.eup %1783  ;;  %1793 = vrcp.f32 %v1154_v26  ;;  %v1152_v30 = vadd.f32 1.0, %v1782_v53  ;;  %v1212_v22 = vpop.permute.xlu1 %1211 }
 0x280   :  { %v1786_v33 = vpop.eup %1785  ;;  %1795 = vrcp.f32 %v1153_v28  ;;  %v1151_v17 = vadd.f32 1.0, %v1784_v29 }
 0x281   :  { %v1788_v39 = vpop.eup %1787  ;;  %1797 = vrcp.f32 %v1152_v30  ;;  %v1150_v15 = vadd.f32 1.0, %v1786_v33  ;;  %v800_v30 = vadd.f32 %v799_v8, %v675_v5 }
 0x282   :  { %1799 = vrcp.f32 %v1151_v17  ;;  %v1149_v21 = vadd.f32 1.0, %v1788_v39 }
 0x283   :  { %v1790_v41 = vpop.eup %1789  ;;  %1801 = vrcp.f32 %v1150_v15  ;;  %v802_v19 = vpop.f32.mrf.mxu2  ;;  %v797_v15 = vadd.f32 %v796_v1, %v670_v0 }
 0x284   :  { %v1792_v46 = vpop.eup %1791  ;;  %v1172_v48 = vmul.f32 %v1790_v41, %v1124_v7  ;;  %1803 = vrcp.f32 %v1149_v21  ;;  %v685_v3 = vpop.permute.xlu2 %684  ;;  %v803_v41 = vadd.f32 %v802_v19, %v680_v20 }
 0x285   :  { %v1794_v32 = vpop.eup %1793  ;;  %v1171_v57 = vmul.f32 %v1792_v46, %v1123_v55  ;;  %v1217_v60 = vpop.permute.xlu0 %1216 }
 0x286   :  { %v1796_v61 = vpop.eup %1795  ;;  %v2571_v62 = vadd.f32 %v1172_v48, %v2432_v40  ;;  %v1170_v59 = vmul.f32 %v1794_v32, %v1122_v27 }
 0x287   :  { %v1798_v47 = vpop.eup %1797  ;;  %v2575_v63 = vadd.f32 %v1171_v57, %v2438_v43  ;;  %v1169_v2 = vmul.f32 %v1796_v61, %v2555_v45  ;;  %v690_v25 = vpop.permute.xlu1 %689 }
 0x288   :  { %1271 = vmatpush.msrb.mxu0 %v2571_v62  ;;  %v1800_v4 = vpop.eup %1799  ;;  %v2580_v6 = vadd.f32 %v1170_v59, %v2442_v35  ;;  %v1168_v7 = vmul.f32 %v1798_v47, %v2557_v38 }
 0x289   :  { %v1802_v40 = vpop.eup %1801  ;;  %v2585_v55 = vadd.f32 %v1169_v2, %v2448_v50  ;;  %v1167_v27 = vmul.f32 %v1800_v4, %v2559_v34 }
 0x28a   :  { %1272 = vmatpush.msrb.mxu0 %v2575_v63  ;;  %v1804_v43 = vpop.eup %1803  ;;  %v2590_v45 = vadd.f32 %v1168_v7, %v2458_v49  ;;  %v1166_v51 = vmul.f32 %v1802_v40, %v2561_v36  ;;  %v1643_v49 = vld [vmem:[%s2688_s10 + $0x40] sm:$0xff] }
 0x28b   :  { %v2595_v35 = vadd.f32 %v1167_v27, %v2466_v54  ;;  %v1165_v38 = vmul.f32 %v1804_v43, %v2563_v37  ;;  %v1644_v54 = vld [vmem:[%s2688_s10 + $0x48] sm:$0xff]  ;;  %v1647_v36 = vld [vmem:[%s2688_s10 + $0x60] sm:$0xff]  ;;  %v805_v23 = vpop.f32.mrf.mxu2 }
 0x28c   :  { %1273 = vmatpush.msrb.mxu0 %v2580_v6  ;;  %v2600_v50 = vadd.f32 %v1166_v51, %v2469_v58  ;;  %v1645_v58 = vld [vmem:[%s2688_s10 + $0x50] sm:$0xff]  ;;  %v1648_v37 = vld [vmem:[%s2688_s10 + $0x68] sm:$0xff]  ;;  %v1222_v24 = vpop.permute.xlu2 %1221  ;;  %v806_v32 = vadd.f32 %v805_v23, %v685_v3 }
 0x28d   :  { %v2604_v34 = vadd.f32 %v1165_v38, %v2474_v52  ;;  %v1646_v52 = vld [vmem:[%s2688_s10 + $0x58] sm:$0xff]  ;;  %v695_v53 = vpop.permute.xlu0 %694 }
 0x28e   :  { %1274 = vmatpush.msrb.mxu0 %v2585_v55 }
 0x28f   :  { %v1227_v48 = vpop.permute.xlu1 %1226 }
 0x290   :  { %1275 = vmatpush.msrb.mxu0 %v2590_v45 }
 0x292   :  { %1276 = vmatpush.msrb.mxu0 %v2595_v35 }
 0x293   :  { %v808_v26 = vpop.f32.mrf.mxu2 }
 0x294   :  { %1277 = vmatpush.msrb.mxu0 %v2600_v50  ;;  %v700_v39 = vpop.permute.xlu2 %699  ;;  %v809_v4 = vadd.f32 %v808_v26, %v690_v25 }
 0x295   :  { %v1232_v43 = vpop.permute.xlu0 %1231 }
 0x296   :  { %1278 = vmatpush.msrb.mxu0 %v2604_v34 }
 0x297   :  { %1659 = vmatmul.msk.f32.vlgmr.msrb.gmra.mxu0 %vm876_vm7, %v1643_v49  ;;  %v705_v1 = vpop.permute.xlu1 %704 }
 0x298   :  { %v818_v0 = vadd.f32 %v2551_v9, %v705_v1 }
 0x29b   :  { %v811_v47 = vpop.f32.mrf.mxu2 }
 0x29c   :  { %v812_v51 = vadd.f32 %v811_v47, %v695_v53 }
 0x29f   :  { %1660 = vmatmul.msk.f32.gmra.mxu0 %vm876_vm7, %v1644_v54 }
 0x2a7   :  { %1661 = vmatmul.msk.f32.gmra.mxu0 %vm876_vm7, %v1645_v58  ;;  %v815_v58 = vadd.f32 %v2549_v16, %v700_v39 }
 0x2af   :  { %1662 = vmatmul.msk.f32.gmra.mxu0 %vm876_vm7, %v1646_v52 }
 0x2b7   :  { %1663 = vmatmul.msk.f32.gmra.mxu0 %vm876_vm7, %v1647_v36 }
 0x2bf   :  { %1664 = vmatmul.msk.f32.gmra.mxu0 %vm876_vm7, %v1648_v37  ;;  %v1237_v37 = vpop.permute.xlu2 %1236 }
 0x2c7   :  { %1665 = vmatmul.msk.f32.gmra.mxu0 %vm876_vm7, %v1649_v42 }
 0x2cf   :  { %1666 = vmatmul.msk.f32.gmra.mxu0 %vm876_vm7, %v1650_v31 }
 0x314   :  { %v1280_v10 = vpop.f32.mrf.mxu0 }
 0x315   :  { %v1281_v33 = vadd.f32 %v1280_v10, %v1202_v14 }
 0x317   :  { %v1304_v57 = vadd.f32 %v1281_v33, %v797_v15  ;;  %v1431_v33 = vpop.permute.xlu0 %1430 }
 0x31c   :  { %v1283_v12 = vpop.f32.mrf.mxu0 }
 0x31d   :  { %v1284_v29 = vadd.f32 %v1283_v12, %v1207_v13 }
 0x31f   :  { %v1305_v21 = vadd.f32 %v1284_v29, %v800_v30 }
 0x321   :  { %v1330_v7 = vadd.f32 %v1305_v21, %v1304_v57 }
 0x324   :  { %v1286_v18 = vpop.f32.mrf.mxu0 }
 0x325   :  { %v1287_v17 = vadd.f32 %v1286_v18, %v1212_v22 }
 0x327   :  { %v1306_v61 = vadd.f32 %v1287_v17, %v803_v41 }
 0x329   :  { %v1331_v38 = vadd.f32 %v1330_v7, %v1306_v61 }
 0x32c   :  { %v1289_v11 = vpop.f32.mrf.mxu0 }
 0x32d   :  { %v1290_v46 = vadd.f32 %v1289_v11, %v1217_v60 }
 0x32f   :  { %v1307_v40 = vadd.f32 %v1290_v46, %v806_v32 }
 0x331   :  { %v1332_v52 = vadd.f32 %v1331_v38, %v1307_v40 }
 0x334   :  { %v1292_v56 = vpop.f32.mrf.mxu0 }
 0x335   :  { %v1293_v59 = vadd.f32 %v1292_v56, %v1222_v24 }
 0x337   :  { %v1308_v49 = vadd.f32 %v1293_v59, %v809_v4  ;;  %v1421_v4 = vpop.permute.xlu0 %1420 }
 0x339   :  { %v1333_v42 = vadd.f32 %v1332_v52, %v1308_v49 }
 0x33c   :  { %v1295_v28 = vpop.f32.mrf.mxu0 }
 0x33d   :  { %v1296_v27 = vadd.f32 %v1295_v28, %v1227_v48 }
 0x33f   :  { %v1309_v36 = vadd.f32 %v1296_v27, %v812_v51 }
 0x341   :  { %v1334_v8 = vadd.f32 %v1333_v42, %v1309_v36 }
 0x344   :  { %v1298_v2 = vpop.f32.mrf.mxu0 }
 0x345   :  { %v1299_v54 = vadd.f32 %v1298_v2, %v1232_v43  ;;  %v1479_v2 = vpop.permute.xlu2 %1478 }
 0x347   :  { %v1310_v31 = vadd.f32 %v1299_v54, %v815_v58  ;;  %v1469_v54 = vpop.permute.xlu0 %1468 }
 0x349   :  { %v1335_v5 = vadd.f32 %v1334_v8, %v1310_v31 }
 0x34c   :  { %v1301_v10 = vpop.f32.mrf.mxu0 }
 0x34d   :  { %v1302_v12 = vadd.f32 %v1301_v10, %v1237_v37 }
 0x34f   :  { %v1311_v13 = vadd.f32 %v1302_v12, %v818_v0  ;;  %v1406_v1 = vpop.permute.xlu0 %1405 }
 0x351   :  { %v1336_v14 = vadd.f32 %v1335_v5, %v1311_v13 }
 0x353   :  { %v1337_v18 = vrot.slane %v1336_v14, 4 }
 0x355   :  { %v1338_v19 = vadd.f32 %v1337_v18, %v1336_v14 }
 0x357   :  { %v1339_v20 = vrot.slane %v1338_v19, 2  ;;  %v1454_v14 = vpop.permute.xlu0 %1453 }
 0x359   :  { %v1340_v11 = vadd.f32 %v1339_v20, %v1338_v19 }
 0x35b   :  { %v1341_v3 = vrot.slane %v1340_v11, 1 }
 0x35d   :  { %v1342_v16 = vadd.f32 %v1341_v3, %v1340_v11 }
 0x35f   :  { %v1343_v22 = vmul.f32 %v1342_v16, %v2255_v44 }
 0x361   :  { %v1344_v23 = vsub.f32 %v1304_v57, %v1343_v22  ;;  %v1345_v60 = vsub.f32 %v1305_v21, %v1343_v22  ;;  %v1346_v56 = vsub.f32 %v1306_v61, %v1343_v22  ;;  %v1350_v24 = vsub.f32 %v1310_v31, %v1343_v22  ;;  %v1426_v21 = vpop.permute.xlu1 %1425 }
 0x362   :  { %v1351_v25 = vsub.f32 %v1311_v13, %v1343_v22  ;;  %v1347_v26 = vsub.f32 %v1307_v40, %v1343_v22  ;;  %v1348_v28 = vsub.f32 %v1308_v49, %v1343_v22  ;;  %v1349_v17 = vsub.f32 %v1309_v36, %v1343_v22  ;;  %v1416_v49 = vpop.permute.xlu2 %1415 }
 0x363   :  { %v1352_v9 = vmul.f32 %v1344_v23, %v1344_v23  ;;  %v1353_v53 = vmul.f32 %v1345_v60, %v1345_v60  ;;  %v1354_v29 = vmul.f32 %v1346_v56, %v1346_v56  ;;  %v1358_v59 = vmul.f32 %v1350_v24, %v1350_v24 }
 0x364   :  { %v1355_v39 = vmul.f32 %v1347_v26, %v1347_v26  ;;  %v1356_v41 = vmul.f32 %v1348_v28, %v1348_v28  ;;  %v1357_v48 = vmul.f32 %v1349_v17, %v1349_v17  ;;  %v1359_v61 = vmul.f32 %v1351_v25, %v1351_v25 }
 0x365   :  { %v1360_v30 = vadd.f32 %v1353_v53, %v1352_v9 }
 0x367   :  { %v1361_v15 = vadd.f32 %v1360_v30, %v1354_v29 }
 0x369   :  { %v1362_v46 = vadd.f32 %v1361_v15, %v1355_v39  ;;  %v1474_v51 = vpop.permute.xlu1 %1473 }
 0x36a   :  { %v1464_v31 = vpop.permute.xlu2 %1463 }
 0x36b   :  { %v1363_v32 = vadd.f32 %v1362_v46, %v1356_v41 }
 0x36d   :  { %v1364_v57 = vadd.f32 %v1363_v32, %v1357_v48 }
 0x36f   :  { %v1365_v47 = vadd.f32 %v1364_v57, %v1358_v59 }
 0x371   :  { %v1366_v7 = vadd.f32 %v1365_v47, %v1359_v61  ;;  %v1411_v42 = vpop.permute.xlu1 %1410  ;;  %v1444_v47 = vpop.permute.xlu0 %1443 }
 0x372   :  { %v1401_v13 = vpop.permute.xlu2 %1400 }
 0x373   :  { %v1367_v40 = vrot.slane %v1366_v7, 4 }
 0x375   :  { %v1368_v27 = vadd.f32 %v1367_v40, %v1366_v7 }
 0x377   :  { %v1369_v43 = vrot.slane %v1368_v27, 2 }
 0x379   :  { %v1370_v38 = vadd.f32 %v1369_v43, %v1368_v27  ;;  %v1459_v12 = vpop.permute.xlu1 %1458 }
 0x37a   :  { %v1449_v61 = vpop.permute.xlu2 %1448 }
 0x37b   :  { %v1371_v58 = vrot.slane %v1370_v38, 1 }
 0x37d   :  { %v1372_v52 = vadd.f32 %v1371_v58, %v1370_v38 }
 0x37f   :  { %v1373_v36 = vmul.f32 %v1372_v52, %v2255_v44 }
 0x381   :  { %v1374_v37 = vadd.f32 1e-05, %v1373_v36  ;;  %v1396_v30 = vpop.permute.xlu1 %1395 }
 0x383   :  { %1805 = vrsqrt.f32 %v1374_v37  ;;  %vm1381_vm12 = vweird.f32 %v1374_v37 }
 0x389   :  { %v1806_v10 = vpop.eup %1805 }
 0x38a   :  { %v1376_v0 = vmul.f32 %v1806_v10, %v1374_v37  ;;  %vm1382_vm11 = vweird.f32 %v1806_v10 }
 0x38b   :  { %vm1383_vm13 = vmor %vm1381_vm12, %vm1382_vm11 }
 0x38c   :  { %v1377_v8 = vmul.f32 %v1806_v10, %v1376_v0 }
 0x38e   :  { %v1378_v5 = vmul.f32 0.5, %v1377_v8 }
 0x390   :  { %v1379_v18 = vsub.f32 1.5, %v1378_v5 }
 0x392   :  { %v1380_v19 = vmul.f32 %v1806_v10, %v1379_v18 }
 0x394   :  { %v1384_v20 = vsel %vm1383_vm13, %v1806_v10, %v1380_v19 }
 0x395   :  { %v1392_v11 = vmul.f32 %v1384_v20, %v1351_v25  ;;  %v1391_v44 = vmul.f32 %v1384_v20, %v1350_v24  ;;  %v1390_v3 = vmul.f32 %v1384_v20, %v1349_v17  ;;  %v1389_v16 = vmul.f32 %v1384_v20, %v1348_v28 }
 0x396   :  { %v1388_v22 = vmul.f32 %v1384_v20, %v1347_v26  ;;  %v1387_v9 = vmul.f32 %v1384_v20, %v1346_v56  ;;  %v1386_v53 = vmul.f32 %v1384_v20, %v1345_v60  ;;  %v1385_v29 = vmul.f32 %v1384_v20, %v1344_v23 }
 0x397   :  { %v1440_v39 = vmul.f32 %v1431_v33, %v1392_v11  ;;  %v1439_v15 = vmul.f32 %v1426_v21, %v1391_v44  ;;  %v1438_v41 = vmul.f32 %v1421_v4, %v1390_v3  ;;  %v1437_v46 = vmul.f32 %v1416_v49, %v1389_v16 }
 0x398   :  { %v1436_v48 = vmul.f32 %v1411_v42, %v1388_v22  ;;  %v1435_v32 = vmul.f32 %v1406_v1, %v1387_v9  ;;  %v1434_v59 = vmul.f32 %v1401_v13, %v1386_v53  ;;  %v1433_v57 = vmul.f32 %v1396_v30, %v1385_v29 }
 0x399   :  { %v1488_v7 = vadd.f32 %v1479_v2, %v1440_v39  ;;  %v1487_v25 = vadd.f32 %v1474_v51, %v1439_v15  ;;  %v1486_v24 = vadd.f32 %v1469_v54, %v1438_v41  ;;  %v2643_v17 = vadd.f32 %v1464_v31, %v1437_v46 }
 0x39a   :  { %v2645_v26 = vadd.f32 %v1459_v12, %v1436_v48  ;;  %v2647_v60 = vadd.f32 %v1454_v14, %v1435_v32  ;;  %v2649_v23 = vadd.f32 %v1449_v61, %v1434_v59  ;;  %v2651_v56 = vadd.f32 %v1444_v47, %v1433_v57 }
 0x39b   :  { %v1496_v28 = vsub.f32 0.0, %v1488_v7  ;;  %v1495_v33 = vsub.f32 0.0, %v1487_v25  ;;  %v1494_v21 = vsub.f32 0.0, %v1486_v24  ;;  %v1493_v4 = vsub.f32 0.0, %v2643_v17 }
 0x39c   :  { %v1492_v40 = vsub.f32 0.0, %v2645_v26  ;;  %v1491_v2 = vsub.f32 0.0, %v2647_v60  ;;  %v1490_v27 = vsub.f32 0.0, %v2649_v23  ;;  %v1489_v54 = vsub.f32 0.0, %v2651_v56 }
 0x39d   :  { %v1511_v43 = vmul.f32 1.442695, %v1496_v28  ;;  %v1509_v51 = vmul.f32 1.442695, %v1495_v33  ;;  %v1507_v38 = vmul.f32 1.442695, %v1494_v21 }
 0x39e   :  { %v1505_v49 = vmul.f32 1.442695, %v1493_v4  ;;  %v1503_v58 = vmul.f32 1.442695, %v1492_v40  ;;  %v1501_v52 = vmul.f32 1.442695, %v1491_v2 }
 0x39f   :  { %1807 = vpow2.f32 %v1511_v43  ;;  %v1499_v36 = vmul.f32 1.442695, %v1490_v27  ;;  %v1497_v37 = vmul.f32 1.442695, %v1489_v54 }
 0x3a0   :  { %1809 = vpow2.f32 %v1509_v51 }
 0x3a1   :  { %1811 = vpow2.f32 %v1507_v38 }
 0x3a2   :  { %1813 = vpow2.f32 %v1505_v49 }
 0x3a3   :  { %1815 = vpow2.f32 %v1503_v58 }
 0x3a4   :  { %1817 = vpow2.f32 %v1501_v52 }
 0x3a5   :  { %v1808_v42 = vpop.eup %1807  ;;  %1819 = vpow2.f32 %v1499_v36 }
 0x3a6   :  { %v1810_v31 = vpop.eup %1809  ;;  %v1520_v1 = vadd.f32 1.0, %v1808_v42  ;;  %1821 = vpow2.f32 %v1497_v37 }
 0x3a7   :  { %v1812_v10 = vpop.eup %1811  ;;  %v1519_v0 = vadd.f32 1.0, %v1810_v31 }
 0x3a8   :  { %v1814_v8 = vpop.eup %1813  ;;  %1823 = vrcp.f32 %v1520_v1  ;;  %v1518_v12 = vadd.f32 1.0, %v1812_v10 }
 0x3a9   :  { %v1816_v5 = vpop.eup %1815  ;;  %1825 = vrcp.f32 %v1519_v0  ;;  %v1517_v13 = vadd.f32 1.0, %v1814_v8 }
 0x3aa   :  { %v1818_v14 = vpop.eup %1817  ;;  %1827 = vrcp.f32 %v1518_v12  ;;  %v1516_v18 = vadd.f32 1.0, %v1816_v5 }
 0x3ab   :  { %v1820_v19 = vpop.eup %1819  ;;  %1829 = vrcp.f32 %v1517_v13  ;;  %v1515_v20 = vadd.f32 1.0, %v1818_v14 }
 0x3ac   :  { %v1822_v11 = vpop.eup %1821  ;;  %1831 = vrcp.f32 %v1516_v18  ;;  %v1514_v44 = vadd.f32 1.0, %v1820_v19 }
 0x3ad   :  { %1833 = vrcp.f32 %v1515_v20  ;;  %v1513_v16 = vadd.f32 1.0, %v1822_v11 }
 0x3ae   :  { %v1824_v3 = vpop.eup %1823  ;;  %1835 = vrcp.f32 %v1514_v44 }
 0x3af   :  { %v1826_v22 = vpop.eup %1825  ;;  %v1536_v9 = vmul.f32 %v1824_v3, %v1488_v7  ;;  %1837 = vrcp.f32 %v1513_v16 }
 0x3b0   :  { %v1828_v53 = vpop.eup %1827  ;;  %v1535_v29 = vmul.f32 %v1826_v22, %v1487_v25 }
 0x3b1   :  { %v1830_v30 = vpop.eup %1829  ;;  %v1544_v39 = vadd.f32 %v1536_v9, %v2571_v62  ;;  %v1534_v15 = vmul.f32 %v1828_v53, %v1486_v24 }
 0x3b2   :  { %v1832_v41 = vpop.eup %1831  ;;  %v1543_v46 = vadd.f32 %v1535_v29, %v2575_v63  ;;  %v1533_v48 = vmul.f32 %v1830_v30, %v2643_v17 }
 0x3b3   :  { %1563 = vmatpush.msra.mxu1 %v1544_v39  ;;  %v1834_v32 = vpop.eup %1833  ;;  %v1542_v59 = vadd.f32 %v1534_v15, %v2580_v6  ;;  %v1532_v57 = vmul.f32 %v1832_v41, %v2645_v26 }
 0x3b4   :  { %v1836_v61 = vpop.eup %1835  ;;  %v1541_v47 = vadd.f32 %v1533_v48, %v2585_v55  ;;  %v1531_v62 = vmul.f32 %v1834_v32, %v2647_v60  ;;  %v1545_v55 = vld [vmem:[%s2694_s16] sm:$0xff] }
 0x3b5   :  { %1564 = vmatpush.msra.mxu1 %v1543_v46  ;;  %v1838_v7 = vpop.eup %1837  ;;  %v1540_v25 = vadd.f32 %v1532_v57, %v2590_v45  ;;  %v1530_v63 = vmul.f32 %v1836_v61, %v2649_v23  ;;  %v1550_v45 = vpop.permute.xlu1 %1549 }
 0x3b6   :  { %v1539_v24 = vadd.f32 %v1531_v62, %v2595_v35  ;;  %v1529_v17 = vmul.f32 %v1838_v7, %v2651_v56 }
 0x3b7   :  { %1565 = vmatpush.msra.mxu1 %v1542_v59  ;;  %v1538_v6 = vadd.f32 %v1530_v63, %v2600_v50 }
 0x3b8   :  { %v1537_v26 = vadd.f32 %v1529_v17, %v2604_v34 }
 0x3b9   :  { %1566 = vmatpush.msra.mxu1 %v1541_v47 }
 0x3bb   :  { %1567 = vmatpush.msra.mxu1 %v1540_v25 }
 0x3bd   :  { %1568 = vmatpush.msra.mxu1 %v1539_v24 }
 0x3bf   :  { %1569 = vmatpush.msra.mxu1 %v1538_v6 }
 0x3c1   :  { %1570 = vmatpush.msra.mxu1 %v1537_v26 }
 0x3c2   :  { %1683 = vmatmul.msk.f32.vlgmr.msra.gmra.mxu1 %vm876_vm7, %v1545_v55 }
 0x43f   :  { %v1572_v60 = vpop.f32.mrf.mxu1 }
 0x440   :  { %v1573_v23 = vadd.f32 %v1572_v60, %v1550_v45 }
 0x442   :  { %v1575_v28 = vmin.f32 %v1573_v23, 20.0  ;;  %vm1587_vm15 = vcmp.gt.f32.partialorder %v1573_v23, 20.0 }
 0x444   :  { %v1576_v35 = vmul.f32 1.442695, %v1575_v28 }
 0x446   :  { %1839 = vpow2.f32 %v1576_v35 }
 0x44c   :  { %v1840_v56 = vpop.eup %1839 }
 0x44d   :  { %v1578_v33 = vadd.f32 1.0, %v1840_v56  ;;  %v1581_v21 = vmul.f32 -0.5, %v1840_v56  ;;  %v1584_v4 = vand.u32 2147483647, %v1840_v56 }
 0x44f   :  { %1841 = vlog2.f32 %v1578_v33  ;;  %v1582_v50 = vadd.f32 1.0, %v1581_v21  ;;  %vm1585_vm14 = vcmp.lt.f32.partialorder %v1584_v4, 0.0004427343 }
 0x451   :  { %v1583_v2 = vmul.f32 %v1840_v56, %v1582_v50 }
 0x455   :  { %v1842_v34 = vpop.eup %1841 }
 0x456   :  { %v1580_v40 = vmul.f32 0.6931472, %v1842_v34 }
 0x458   :  { %v1586_v27 = vsel %vm1585_vm14, %v1583_v2, %v1580_v40 }
 0x459   :  { %v1588_v43 = vsel %vm1587_vm15, %v1573_v23, %v1586_v27 }
 0x45a   :  { %1589 = vst [vmem:[#allocation2] sm:$0xff] %v1588_v43 }
 0x45b   :  { %1600 = dma.vmem_to_hbm [thread:$0]  %s1596_s0, 128, %s1598_s19, [#allocation3]  }
 0x45c   :  { %1867 = dma.done.wait [#allocation3], 128  }
 0x45d   :  { %1868 = vsyncadd [#allocation3], 4294967168 }
 0x45e   :  { %1605 = vsyncpa [#allocation3], 1 }

</bundles_post_ra>
